<compile_context>
chip_gen: v7x
topology: tpu7x:2x2x1
jax: 0.10.0
libtpu: 0.0.40
codegen_flags: <defaults>
</compile_context>

<pallas_src>
import jax
import jax.numpy as jnp
from jax.experimental import pallas as pl
from jax.experimental.pallas import tpu as pltpu

INPUT_SIZE = 28
HIDDEN_SIZE = 32
LAYERS = 2
OUT_SIZE = 10
DROP_RATE = 0.2  # see TODO(synk) below


def _round_up(n, m):
    return ((n + m - 1) // m) * m


# ------------------------------ Fused kernel ---------------------------------
def _fused_lstm_kernel(x_ref, wih0_ref, b0_ref, wcomb_ref, b1_ref,
                       wout_ref, bout_ref, out_ref, xp_ref, hseq_ref):
    """One grid step = one batch tile: wavefronted 2-layer LSTM + Linear head."""
    B, S, I = x_ref.shape          # batch tile, seq len, input size (static)
    H = HIDDEN_SIZE
    G = 4 * H

    # Hoisted layer-0 input projection for ALL timesteps: one (B*S, I)x(I, 4H)
    # matmul, materialized into VMEM scratch so it is never live in vregs
    # across the unrolled recurrence.
    x2d = x_ref[...].reshape(B * S, I)
    xp_ref[...] = (jnp.dot(x2d, wih0_ref[...],
                           preferred_element_type=jnp.float32)
                   + b0_ref[...]).reshape(B, S, G)

    wcomb = wcomb_ref[...]          # (2H, 8H) fused recurrent weight
    b1 = b1_ref[...]                # (1, 4H)  layer-1 bias (b_ih + b_hh)

    def cell(gates, h, c):
        # Gate columns are pre-permuted to [i | f | o | g]: one contiguous
        # sigmoid over 3H lanes, tanh only on the trailing H (g) lanes.
        sg = jax.nn.sigmoid(gates[:, 0:3 * H])
        gg = jnp.tanh(gates[:, 3 * H:4 * H])
        i_g = sg[:, 0:H]
        f_g = sg[:, H:2 * H]
        o_g = sg[:, 2 * H:3 * H]
        c_new = f_g * c + i_g * gg
        h_new = o_g * jnp.tanh(c_new)
        return h_new, c_new

    zeros = jnp.zeros((B, H), jnp.float32)

    # Combined step 0: layer 0 only (h0_{-1} = c0_{-1} = 0 -> no recurrent
    # matmul needed at all for this step).
    h0, c0 = cell(xp_ref[:, 0, :], zeros, zeros)
    h1, c1 = zeros, zeros

    # Wavefront over combined steps s = 1..S: layer 0 consumes timestep s,
    # layer 1 consumes timestep s-1, both fed by ONE fused matmul per step.
    # Statically unrolled (S is small and static).
    # TODO(synk): if S grows past ~32, switch to lax.fori_loop with h/c
    # carries and keep xp/hseq in scratch to bound vreg live ranges.
    for s in range(1, S + 1):
        mm = jnp.dot(jnp.concatenate([h0, h1], axis=1), wcomb,
                     preferred_element_type=jnp.float32)       # (B, 8H)
        # Layer 1, timestep s-1 (its input h0_{s-1} is the *old* h0 already
        # baked into mm above, so update order below is safe).
        h1, c1 = cell(mm[:, G:2 * G] + b1, h1, c1)
        # Only per-step store left; inherently 32/128-lane masked since H=32.
        hseq_ref[:, s - 1, :] = h1
        # Layer 0, timestep s (skipped on the final drain step).
        if s < S:
            h0, c0 = cell(mm[:, 0:G] + xp_ref[:, s, :], h0, c0)

    # TODO(synk): inter-layer dropout (p=0.2) omitted — matches PyTorch
    # eval/inference semantics (training-mode dropout is stochastic).

    # Linear head over the whole layer-1 output sequence: one matmul and one
    # store at the very end (nothing per-step).
    y = (jnp.dot(hseq_ref[...].reshape(B * S, H), wout_ref[...],
                 preferred_element_type=jnp.float32) + bout_ref[...])
    out_ref[...] = y.reshape(B, S, OUT_SIZE)


# ------------------------------ Weight prep -----------------------------------
def _prep_weights(params):
    """Transpose / permute / stack weights once outside the kernel."""
    H = HIDDEN_SIZE
    # PyTorch gate order is [i | f | g | o]; permute columns to [i | f | o | g]
    # so the kernel can sigmoid one contiguous 3H slab and tanh the last H.
    perm = jnp.concatenate([jnp.arange(0, 2 * H),
                            jnp.arange(3 * H, 4 * H),
                            jnp.arange(2 * H, 3 * H)])

    def tperm(w):                                   # (4H, in) -> (in, 4H) permuted
        return jnp.transpose(w)[:, perm]

    wih0 = tperm(params["w_ih_l0"])                                   # (I, 4H)
    whh0 = tperm(params["w_hh_l0"])                                   # (H, 4H)
    b0 = (params["b_ih_l0"] + params["b_hh_l0"])[perm].reshape(1, 4 * H)
    wih1 = tperm(params["w_ih_l1"])                                   # (H, 4H)
    whh1 = tperm(params["w_hh_l1"])                                   # (H, 4H)
    b1 = (params["b_ih_l1"] + params["b_hh_l1"])[perm].reshape(1, 4 * H)

    # Fused recurrent weight for the wavefront:
    #   [h0 | h1] (B, 2H) @ wcomb (2H, 8H):
    #     cols 0:4H   = layer-0 gates' recurrent part   (h0 @ Whh0)
    #     cols 4H:8H  = layer-1 gates' input+recurrent  (h0 @ Wih1 + h1 @ Whh1)
    z = jnp.zeros((H, 4 * H), jnp.float32)
    wcomb = jnp.concatenate(
        [jnp.concatenate([whh0, wih1], axis=1),
         jnp.concatenate([z, whh1], axis=1)], axis=0)                 # (2H, 8H)

    wout = jnp.transpose(params["w_out"])                             # (H, O)
    bout = params["b_out"].reshape(1, OUT_SIZE)                       # (1, O)
    return wih0, b0, wcomb, b1, wout, bout


# ------------------------------ Model forward ---------------------------------
def lstm_model_forward(x, params, *, block_b=None):
    """x: (B, S, INPUT_SIZE) batch_first -> (B, S, 10)."""
    B, S, I = x.shape
    assert I == INPUT_SIZE
    H = HIDDEN_SIZE

    # Batch tiling: pad tiny batches up to >= 8 rows (fills vreg sublanes /
    # MXU rows), cap the tile at 256 so large batches produce >= 2 grid steps
    # (v7x megacore sharding via the "parallel" grid axis).
    if block_b is None:
        block_b = min(256, _round_up(max(B, 8), 8))
    padded_B = _round_up(B, block_b)

    x_f32 = x.astype(jnp.float32)
    if padded_B != B:
        x_f32 = jnp.pad(x_f32, ((0, padded_B - B), (0, 0), (0, 0)))

    wih0, b0, wcomb, b1, wout, bout = _prep_weights(params)

    xmap = lambda b: (b, 0, 0)
    wmap = lambda b: (0, 0)

    out = pl.pallas_call(
        _fused_lstm_kernel,
        out_shape=jax.ShapeDtypeStruct((padded_B, S, OUT_SIZE), jnp.float32),
        grid_spec=pltpu.PrefetchScalarGridSpec(
            num_scalar_prefetch=0,
            grid=(padded_B // block_b,),
            in_specs=[
                pl.BlockSpec((block_b, S, I), xmap),          # x
                pl.BlockSpec((INPUT_SIZE, 4 * H), wmap),      # W_ih layer 0 (permuted)
                pl.BlockSpec((1, 4 * H), wmap),               # bias  layer 0
                pl.BlockSpec((2 * H, 8 * H), wmap),           # fused recurrent weight
                pl.BlockSpec((1, 4 * H), wmap),               # bias  layer 1
                pl.BlockSpec((H, OUT_SIZE), wmap),            # head weight
                pl.BlockSpec((1, OUT_SIZE), wmap),            # head bias
            ],
            out_specs=pl.BlockSpec((block_b, S, OUT_SIZE), xmap),
            scratch_shapes=[
                pltpu.VMEM((block_b, S, 4 * H), jnp.float32),  # hoisted layer-0 proj
                pltpu.VMEM((block_b, S, H), jnp.float32),      # layer-1 h sequence
            ],
        ),
        compiler_params=pltpu.CompilerParams(
            dimension_semantics=("parallel",)),                # batch tiles independent
    )(x_f32, wih0, b0, wcomb, b1, wout, bout)

    return out[:B] if padded_B != B else out


# --------------------------- Pure-JAX reference --------------------------------
def lstm_model_ref(x, params):
    B, S, _ = x.shape
    h_seq = jnp.transpose(x, (1, 0, 2)).astype(jnp.float32)
    for l in range(LAYERS):
        w_ih = params[f"w_ih_l{l}"]
        w_hh = params[f"w_hh_l{l}"]
        b = params[f"b_ih_l{l}"] + params[f"b_hh_l{l}"]

        def step(carry, x_t, w_ih=w_ih, w_hh=w_hh, b=b):
            h, c = carry
            gates = x_t @ w_ih.T + h @ w_hh.T + b
            i, f, g, o = jnp.split(gates, 4, axis=-1)
            i = jax.nn.sigmoid(i); f = jax.nn.sigmoid(f)
            g = jnp.tanh(g); o = jax.nn.sigmoid(o)
            c = f * c + i * g
            h = o * jnp.tanh(c)
            return (h, c), h

        init = (jnp.zeros((B, HIDDEN_SIZE), jnp.float32),
                jnp.zeros((B, HIDDEN_SIZE), jnp.float32))
        _, h_seq = jax.lax.scan(step, init, h_seq)
    r_out = jnp.transpose(h_seq, (1, 0, 2))
    return r_out @ params["w_out"].T + params["b_out"]


# -------------------------------- Parameters -----------------------------------
def init_params(key):
    """Deterministic init matching PyTorch LSTM/Linear parameter shapes."""
    params = {}
    k = 1.0 / jnp.sqrt(jnp.float32(HIDDEN_SIZE))
    keys = jax.random.split(key, 4 * LAYERS + 2)
    ki = 0
    for l in range(LAYERS):
        in_dim = INPUT_SIZE if l == 0 else HIDDEN_SIZE
        params[f"w_ih_l{l}"] = jax.random.uniform(
            keys[ki], (4 * HIDDEN_SIZE, in_dim), jnp.float32, -k, k); ki += 1
        params[f"w_hh_l{l}"] = jax.random.uniform(
            keys[ki], (4 * HIDDEN_SIZE, HIDDEN_SIZE), jnp.float32, -k, k); ki += 1
        params[f"b_ih_l{l}"] = jax.random.uniform(
            keys[ki], (4 * HIDDEN_SIZE,), jnp.float32, -k, k); ki += 1
        params[f"b_hh_l{l}"] = jax.random.uniform(
            keys[ki], (4 * HIDDEN_SIZE,), jnp.float32, -k, k); ki += 1
    params["w_out"] = jax.random.uniform(
        keys[ki], (OUT_SIZE, HIDDEN_SIZE), jnp.float32, -k, k); ki += 1
    params["b_out"] = jax.random.uniform(
        keys[ki], (OUT_SIZE,), jnp.float32, -k, k)
    return params


if __name__ == "__main__":
    key = jax.random.PRNGKey(0)
    pkey, xkey = jax.random.split(key)
    params = init_params(pkey)

    B, S = 2, 8
    x = jax.random.normal(xkey, (B, S, INPUT_SIZE), dtype=jnp.float32)

    out = jax.jit(lstm_model_forward)(x, params)
    out = jax.block_until_ready(out)
    assert out.shape == (B, S, OUT_SIZE), out.shape

    ref = jax.block_until_ready(lstm_model_ref(x, params))
    assert jnp.allclose(out, ref, atol=1e-4, rtol=1e-4), \
        f"max abs err {jnp.max(jnp.abs(out - ref))}"

    print("KERNEL_OK")
</pallas_src>

<mosaic_0001>
module attributes {stable_mosaic.version = 11 : i64} {
  func.func @_fused_lstm_kernel(%arg0: i32, %arg1: memref<8x8x28xf32, #tpu.memory_space<vmem>>, %arg2: memref<28x128xf32, #tpu.memory_space<vmem>>, %arg3: memref<1x128xf32, #tpu.memory_space<vmem>>, %arg4: memref<64x256xf32, #tpu.memory_space<vmem>>, %arg5: memref<1x128xf32, #tpu.memory_space<vmem>>, %arg6: memref<32x10xf32, #tpu.memory_space<vmem>>, %arg7: memref<1x10xf32, #tpu.memory_space<vmem>>, %arg8: memref<8x8x10xf32, #tpu.memory_space<vmem>>, %arg9: memref<8x8x128xf32, #tpu.memory_space<vmem>>, %arg10: memref<8x8x32xf32, #tpu.memory_space<vmem>>) attributes {dimension_semantics = [#tpu.dimension_semantics<parallel>], iteration_bounds = array<i64: 1>, scalar_prefetch = 0 : i64, scratch_operands = 2 : i64, tpu.core_type = #tpu.core_type<tc>, window_params = [{transform_indices = @transform_0, window_bounds = array<i64: 8, 8, 28>}, {pipeline_mode = #tpu.pipeline_mode<synchronous>, transform_indices = @transform_1, window_bounds = array<i64: 28, 128>}, {pipeline_mode = #tpu.pipeline_mode<synchronous>, transform_indices = @transform_2, window_bounds = array<i64: 1, 128>}, {pipeline_mode = #tpu.pipeline_mode<synchronous>, transform_indices = @transform_3, window_bounds = array<i64: 64, 256>}, {pipeline_mode = #tpu.pipeline_mode<synchronous>, transform_indices = @transform_4, window_bounds = array<i64: 1, 128>}, {pipeline_mode = #tpu.pipeline_mode<synchronous>, transform_indices = @transform_5, window_bounds = array<i64: 32, 10>}, {pipeline_mode = #tpu.pipeline_mode<synchronous>, transform_indices = @transform_6, window_bounds = array<i64: 1, 10>}, {transform_indices = @transform_7, window_bounds = array<i64: 8, 8, 10>}]} {
    %c0 = arith.constant 0 : index
    %c0_0 = arith.constant 0 : index
    %c0_1 = arith.constant 0 : index
    %0 = vector.load %arg1[%c0, %c0_0, %c0_1] : memref<8x8x28xf32, #tpu.memory_space<vmem>>, vector<8x8x28xf32>
    %1 = vector.shape_cast %0 : vector<8x8x28xf32> to vector<64x28xf32>
    %c0_2 = arith.constant 0 : index
    %c0_3 = arith.constant 0 : index
    %2 = vector.load %arg2[%c0_2, %c0_3] : memref<28x128xf32, #tpu.memory_space<vmem>>, vector<28x128xf32>
    %cst = arith.constant dense<0.000000e+00> : vector<64x128xf32>
    %3 = tpu.matmul %1, %2, %cst {dimension_numbers = #tpu.dot_dimension_numbers<[1], [0], [0], [1], [0, 0, 1, 1], [], []>} : vector<64x28xf32>, vector<28x128xf32>, vector<64x128xf32> -> vector<64x128xf32>
    %c0_4 = arith.constant 0 : index
    %c0_5 = arith.constant 0 : index
    %4 = vector.load %arg3[%c0_4, %c0_5] : memref<1x128xf32, #tpu.memory_space<vmem>>, vector<1x128xf32>
    %5 = vector.broadcast %4 : vector<1x128xf32> to vector<64x128xf32>
    %6 = arith.addf %3, %5 : vector<64x128xf32>
    %7 = vector.shape_cast %6 : vector<64x128xf32> to vector<8x8x128xf32>
    %c0_6 = arith.constant 0 : index
    %c0_7 = arith.constant 0 : index
    %c0_8 = arith.constant 0 : index
    %8 = vector.load %arg9[%c0_6, %c0_7, %c0_8] : memref<8x8x128xf32, #tpu.memory_space<vmem>>, vector<8x8x128xf32>
    tpu.vector_store %arg9[%c0_6, %c0_7, %c0_8], %7 {strides = array<i32>} : memref<8x8x128xf32, #tpu.memory_space<vmem>>, vector<8x8x128xf32>,
    %c0_9 = arith.constant 0 : index
    %c0_10 = arith.constant 0 : index
    %9 = vector.load %arg4[%c0_9, %c0_10] : memref<64x256xf32, #tpu.memory_space<vmem>>, vector<64x256xf32>
    %c0_11 = arith.constant 0 : index
    %c0_12 = arith.constant 0 : index
    %10 = vector.load %arg5[%c0_11, %c0_12] : memref<1x128xf32, #tpu.memory_space<vmem>>, vector<1x128xf32>
    %cst_13 = arith.constant 0.000000e+00 : f32
    %11 = vector.broadcast %cst_13 : f32 to vector<8x32xf32>
    %c0_14 = arith.constant 0 : index
    %c0_15 = arith.constant 0 : index
    %c0_16 = arith.constant 0 : index
    %12 = vector.load %arg9[%c0_14, %c0_15, %c0_16] : memref<8x8x128xf32, #tpu.memory_space<vmem>>, vector<8x1x128xf32>
    %13 = vector.shape_cast %12 : vector<8x1x128xf32> to vector<8x128xf32>
    %14 = vector.extract_strided_slice %13 {offsets = [0, 0], sizes = [8, 96], strides = [1, 1]} : vector<8x128xf32> to vector<8x96xf32>
    %15 = arith.negf %14 : vector<8x96xf32>
    %16 = math.exp %15 : vector<8x96xf32>
    %cst_17 = arith.constant 1.000000e+00 : f32
    %17 = vector.broadcast %cst_17 : f32 to vector<8x96xf32>
    %18 = arith.addf %17, %16 : vector<8x96xf32>
    %19 = arith.divf %17, %18 : vector<8x96xf32>
    %20 = vector.extract_strided_slice %13 {offsets = [0, 96], sizes = [8, 32], strides = [1, 1]} : vector<8x128xf32> to vector<8x32xf32>
    %21 = math.tanh %20 : vector<8x32xf32>
    %22 = vector.extract_strided_slice %19 {offsets = [0, 0], sizes = [8, 32], strides = [1, 1]} : vector<8x96xf32> to vector<8x32xf32>
    %23 = vector.extract_strided_slice %19 {offsets = [0, 32], sizes = [8, 32], strides = [1, 1]} : vector<8x96xf32> to vector<8x32xf32>
    %24 = vector.extract_strided_slice %19 {offsets = [0, 64], sizes = [8, 32], strides = [1, 1]} : vector<8x96xf32> to vector<8x32xf32>
    %25 = arith.mulf %23, %11 : vector<8x32xf32>
    %26 = arith.mulf %22, %21 : vector<8x32xf32>
    %27 = arith.addf %25, %26 : vector<8x32xf32>
    %28 = math.tanh %27 : vector<8x32xf32>
    %29 = arith.mulf %24, %28 : vector<8x32xf32>
    %30 = tpu.concatenate %29, %11 in 1 : vector<8x32xf32>, vector<8x32xf32> -> vector<8x64xf32>
    %cst_18 = arith.constant dense<0.000000e+00> : vector<8x256xf32>
    %31 = tpu.matmul %30, %9, %cst_18 {dimension_numbers = #tpu.dot_dimension_numbers<[1], [0], [0], [1], [0, 0, 1, 1], [], []>} : vector<8x64xf32>, vector<64x256xf32>, vector<8x256xf32> -> vector<8x256xf32>
    %32 = vector.extract_strided_slice %31 {offsets = [0, 128], sizes = [8, 128], strides = [1, 1]} : vector<8x256xf32> to vector<8x128xf32>
    %33 = vector.broadcast %10 : vector<1x128xf32> to vector<8x128xf32>
    %34 = arith.addf %32, %33 : vector<8x128xf32>
    %35 = vector.extract_strided_slice %34 {offsets = [0, 0], sizes = [8, 96], strides = [1, 1]} : vector<8x128xf32> to vector<8x96xf32>
    %36 = arith.negf %35 : vector<8x96xf32>
    %37 = math.exp %36 : vector<8x96xf32>
    %cst_19 = arith.constant 1.000000e+00 : f32
    %38 = vector.broadcast %cst_19 : f32 to vector<8x96xf32>
    %39 = arith.addf %38, %37 : vector<8x96xf32>
    %40 = arith.divf %38, %39 : vector<8x96xf32>
    %41 = vector.extract_strided_slice %34 {offsets = [0, 96], sizes = [8, 32], strides = [1, 1]} : vector<8x128xf32> to vector<8x32xf32>
    %42 = math.tanh %41 : vector<8x32xf32>
    %43 = vector.extract_strided_slice %40 {offsets = [0, 0], sizes = [8, 32], strides = [1, 1]} : vector<8x96xf32> to vector<8x32xf32>
    %44 = vector.extract_strided_slice %40 {offsets = [0, 32], sizes = [8, 32], strides = [1, 1]} : vector<8x96xf32> to vector<8x32xf32>
    %45 = vector.extract_strided_slice %40 {offsets = [0, 64], sizes = [8, 32], strides = [1, 1]} : vector<8x96xf32> to vector<8x32xf32>
    %46 = arith.mulf %44, %11 : vector<8x32xf32>
    %47 = arith.mulf %43, %42 : vector<8x32xf32>
    %48 = arith.addf %46, %47 : vector<8x32xf32>
    %49 = math.tanh %48 : vector<8x32xf32>
    %50 = arith.mulf %45, %49 : vector<8x32xf32>
    %c0_20 = arith.constant 0 : index
    %c0_21 = arith.constant 0 : index
    %c0_22 = arith.constant 0 : index
    %51 = vector.load %arg10[%c0_20, %c0_21, %c0_22] : memref<8x8x32xf32, #tpu.memory_space<vmem>>, vector<8x1x32xf32>
    %52 = vector.shape_cast %51 : vector<8x1x32xf32> to vector<8x32xf32>
    %53 = vector.shape_cast %50 : vector<8x32xf32> to vector<8x1x32xf32>
    tpu.vector_store %arg10[%c0_20, %c0_21, %c0_22], %53 {strides = array<i32>} : memref<8x8x32xf32, #tpu.memory_space<vmem>>, vector<8x1x32xf32>,
    %54 = vector.extract_strided_slice %31 {offsets = [0, 0], sizes = [8, 128], strides = [1, 1]} : vector<8x256xf32> to vector<8x128xf32>
    %c0_23 = arith.constant 0 : index
    %c1 = arith.constant 1 : index
    %c0_24 = arith.constant 0 : index
    %55 = vector.load %arg9[%c0_23, %c1, %c0_24] : memref<8x8x128xf32, #tpu.memory_space<vmem>>, vector<8x1x128xf32>
    %56 = vector.shape_cast %55 : vector<8x1x128xf32> to vector<8x128xf32>
    %57 = arith.addf %54, %56 : vector<8x128xf32>
    %58 = vector.extract_strided_slice %57 {offsets = [0, 0], sizes = [8, 96], strides = [1, 1]} : vector<8x128xf32> to vector<8x96xf32>
    %59 = arith.negf %58 : vector<8x96xf32>
    %60 = math.exp %59 : vector<8x96xf32>
    %cst_25 = arith.constant 1.000000e+00 : f32
    %61 = vector.broadcast %cst_25 : f32 to vector<8x96xf32>
    %62 = arith.addf %61, %60 : vector<8x96xf32>
    %63 = arith.divf %61, %62 : vector<8x96xf32>
    %64 = vector.extract_strided_slice %57 {offsets = [0, 96], sizes = [8, 32], strides = [1, 1]} : vector<8x128xf32> to vector<8x32xf32>
    %65 = math.tanh %64 : vector<8x32xf32>
    %66 = vector.extract_strided_slice %63 {offsets = [0, 0], sizes = [8, 32], strides = [1, 1]} : vector<8x96xf32> to vector<8x32xf32>
    %67 = vector.extract_strided_slice %63 {offsets = [0, 32], sizes = [8, 32], strides = [1, 1]} : vector<8x96xf32> to vector<8x32xf32>
    %68 = vector.extract_strided_slice %63 {offsets = [0, 64], sizes = [8, 32], strides = [1, 1]} : vector<8x96xf32> to vector<8x32xf32>
    %69 = arith.mulf %67, %27 : vector<8x32xf32>
    %70 = arith.mulf %66, %65 : vector<8x32xf32>
    %71 = arith.addf %69, %70 : vector<8x32xf32>
    %72 = math.tanh %71 : vector<8x32xf32>
    %73 = arith.mulf %68, %72 : vector<8x32xf32>
    %74 = tpu.concatenate %73, %50 in 1 : vector<8x32xf32>, vector<8x32xf32> -> vector<8x64xf32>
    %cst_26 = arith.constant dense<0.000000e+00> : vector<8x256xf32>
    %75 = tpu.matmul %74, %9, %cst_26 {dimension_numbers = #tpu.dot_dimension_numbers<[1], [0], [0], [1], [0, 0, 1, 1], [], []>} : vector<8x64xf32>, vector<64x256xf32>, vector<8x256xf32> -> vector<8x256xf32>
    %76 = vector.extract_strided_slice %75 {offsets = [0, 128], sizes = [8, 128], strides = [1, 1]} : vector<8x256xf32> to vector<8x128xf32>
    %77 = vector.broadcast %10 : vector<1x128xf32> to vector<8x128xf32>
    %78 = arith.addf %76, %77 : vector<8x128xf32>
    %79 = vector.extract_strided_slice %78 {offsets = [0, 0], sizes = [8, 96], strides = [1, 1]} : vector<8x128xf32> to vector<8x96xf32>
    %80 = arith.negf %79 : vector<8x96xf32>
    %81 = math.exp %80 : vector<8x96xf32>
    %cst_27 = arith.constant 1.000000e+00 : f32
    %82 = vector.broadcast %cst_27 : f32 to vector<8x96xf32>
    %83 = arith.addf %82, %81 : vector<8x96xf32>
    %84 = arith.divf %82, %83 : vector<8x96xf32>
    %85 = vector.extract_strided_slice %78 {offsets = [0, 96], sizes = [8, 32], strides = [1, 1]} : vector<8x128xf32> to vector<8x32xf32>
    %86 = math.tanh %85 : vector<8x32xf32>
    %87 = vector.extract_strided_slice %84 {offsets = [0, 0], sizes = [8, 32], strides = [1, 1]} : vector<8x96xf32> to vector<8x32xf32>
    %88 = vector.extract_strided_slice %84 {offsets = [0, 32], sizes = [8, 32], strides = [1, 1]} : vector<8x96xf32> to vector<8x32xf32>
    %89 = vector.extract_strided_slice %84 {offsets = [0, 64], sizes = [8, 32], strides = [1, 1]} : vector<8x96xf32> to vector<8x32xf32>
    %90 = arith.mulf %88, %48 : vector<8x32xf32>
    %91 = arith.mulf %87, %86 : vector<8x32xf32>
    %92 = arith.addf %90, %91 : vector<8x32xf32>
    %93 = math.tanh %92 : vector<8x32xf32>
    %94 = arith.mulf %89, %93 : vector<8x32xf32>
    %c0_28 = arith.constant 0 : index
    %c1_29 = arith.constant 1 : index
    %c0_30 = arith.constant 0 : index
    %95 = vector.load %arg10[%c0_28, %c1_29, %c0_30] : memref<8x8x32xf32, #tpu.memory_space<vmem>>, vector<8x1x32xf32>
    %96 = vector.shape_cast %95 : vector<8x1x32xf32> to vector<8x32xf32>
    %97 = vector.shape_cast %94 : vector<8x32xf32> to vector<8x1x32xf32>
    tpu.vector_store %arg10[%c0_28, %c1_29, %c0_30], %97 {strides = array<i32>} : memref<8x8x32xf32, #tpu.memory_space<vmem>>, vector<8x1x32xf32>,
    %98 = vector.extract_strided_slice %75 {offsets = [0, 0], sizes = [8, 128], strides = [1, 1]} : vector<8x256xf32> to vector<8x128xf32>
    %c0_31 = arith.constant 0 : index
    %c2 = arith.constant 2 : index
    %c0_32 = arith.constant 0 : index
    %99 = vector.load %arg9[%c0_31, %c2, %c0_32] : memref<8x8x128xf32, #tpu.memory_space<vmem>>, vector<8x1x128xf32>
    %100 = vector.shape_cast %99 : vector<8x1x128xf32> to vector<8x128xf32>
    %101 = arith.addf %98, %100 : vector<8x128xf32>
    %102 = vector.extract_strided_slice %101 {offsets = [0, 0], sizes = [8, 96], strides = [1, 1]} : vector<8x128xf32> to vector<8x96xf32>
    %103 = arith.negf %102 : vector<8x96xf32>
    %104 = math.exp %103 : vector<8x96xf32>
    %cst_33 = arith.constant 1.000000e+00 : f32
    %105 = vector.broadcast %cst_33 : f32 to vector<8x96xf32>
    %106 = arith.addf %105, %104 : vector<8x96xf32>
    %107 = arith.divf %105, %106 : vector<8x96xf32>
    %108 = vector.extract_strided_slice %101 {offsets = [0, 96], sizes = [8, 32], strides = [1, 1]} : vector<8x128xf32> to vector<8x32xf32>
    %109 = math.tanh %108 : vector<8x32xf32>
    %110 = vector.extract_strided_slice %107 {offsets = [0, 0], sizes = [8, 32], strides = [1, 1]} : vector<8x96xf32> to vector<8x32xf32>
    %111 = vector.extract_strided_slice %107 {offsets = [0, 32], sizes = [8, 32], strides = [1, 1]} : vector<8x96xf32> to vector<8x32xf32>
    %112 = vector.extract_strided_slice %107 {offsets = [0, 64], sizes = [8, 32], strides = [1, 1]} : vector<8x96xf32> to vector<8x32xf32>
    %113 = arith.mulf %111, %71 : vector<8x32xf32>
    %114 = arith.mulf %110, %109 : vector<8x32xf32>
    %115 = arith.addf %113, %114 : vector<8x32xf32>
    %116 = math.tanh %115 : vector<8x32xf32>
    %117 = arith.mulf %112, %116 : vector<8x32xf32>
    %118 = tpu.concatenate %117, %94 in 1 : vector<8x32xf32>, vector<8x32xf32> -> vector<8x64xf32>
    %cst_34 = arith.constant dense<0.000000e+00> : vector<8x256xf32>
    %119 = tpu.matmul %118, %9, %cst_34 {dimension_numbers = #tpu.dot_dimension_numbers<[1], [0], [0], [1], [0, 0, 1, 1], [], []>} : vector<8x64xf32>, vector<64x256xf32>, vector<8x256xf32> -> vector<8x256xf32>
    %120 = vector.extract_strided_slice %119 {offsets = [0, 128], sizes = [8, 128], strides = [1, 1]} : vector<8x256xf32> to vector<8x128xf32>
    %121 = vector.broadcast %10 : vector<1x128xf32> to vector<8x128xf32>
    %122 = arith.addf %120, %121 : vector<8x128xf32>
    %123 = vector.extract_strided_slice %122 {offsets = [0, 0], sizes = [8, 96], strides = [1, 1]} : vector<8x128xf32> to vector<8x96xf32>
    %124 = arith.negf %123 : vector<8x96xf32>
    %125 = math.exp %124 : vector<8x96xf32>
    %cst_35 = arith.constant 1.000000e+00 : f32
    %126 = vector.broadcast %cst_35 : f32 to vector<8x96xf32>
    %127 = arith.addf %126, %125 : vector<8x96xf32>
    %128 = arith.divf %126, %127 : vector<8x96xf32>
    %129 = vector.extract_strided_slice %122 {offsets = [0, 96], sizes = [8, 32], strides = [1, 1]} : vector<8x128xf32> to vector<8x32xf32>
    %130 = math.tanh %129 : vector<8x32xf32>
    %131 = vector.extract_strided_slice %128 {offsets = [0, 0], sizes = [8, 32], strides = [1, 1]} : vector<8x96xf32> to vector<8x32xf32>
    %132 = vector.extract_strided_slice %128 {offsets = [0, 32], sizes = [8, 32], strides = [1, 1]} : vector<8x96xf32> to vector<8x32xf32>
    %133 = vector.extract_strided_slice %128 {offsets = [0, 64], sizes = [8, 32], strides = [1, 1]} : vector<8x96xf32> to vector<8x32xf32>
    %134 = arith.mulf %132, %92 : vector<8x32xf32>
    %135 = arith.mulf %131, %130 : vector<8x32xf32>
    %136 = arith.addf %134, %135 : vector<8x32xf32>
    %137 = math.tanh %136 : vector<8x32xf32>
    %138 = arith.mulf %133, %137 : vector<8x32xf32>
    %c0_36 = arith.constant 0 : index
    %c2_37 = arith.constant 2 : index
    %c0_38 = arith.constant 0 : index
    %139 = vector.load %arg10[%c0_36, %c2_37, %c0_38] : memref<8x8x32xf32, #tpu.memory_space<vmem>>, vector<8x1x32xf32>
    %140 = vector.shape_cast %139 : vector<8x1x32xf32> to vector<8x32xf32>
    %141 = vector.shape_cast %138 : vector<8x32xf32> to vector<8x1x32xf32>
    tpu.vector_store %arg10[%c0_36, %c2_37, %c0_38], %141 {strides = array<i32>} : memref<8x8x32xf32, #tpu.memory_space<vmem>>, vector<8x1x32xf32>,
    %142 = vector.extract_strided_slice %119 {offsets = [0, 0], sizes = [8, 128], strides = [1, 1]} : vector<8x256xf32> to vector<8x128xf32>
    %c0_39 = arith.constant 0 : index
    %c3 = arith.constant 3 : index
    %c0_40 = arith.constant 0 : index
    %143 = vector.load %arg9[%c0_39, %c3, %c0_40] : memref<8x8x128xf32, #tpu.memory_space<vmem>>, vector<8x1x128xf32>
    %144 = vector.shape_cast %143 : vector<8x1x128xf32> to vector<8x128xf32>
    %145 = arith.addf %142, %144 : vector<8x128xf32>
    %146 = vector.extract_strided_slice %145 {offsets = [0, 0], sizes = [8, 96], strides = [1, 1]} : vector<8x128xf32> to vector<8x96xf32>
    %147 = arith.negf %146 : vector<8x96xf32>
    %148 = math.exp %147 : vector<8x96xf32>
    %cst_41 = arith.constant 1.000000e+00 : f32
    %149 = vector.broadcast %cst_41 : f32 to vector<8x96xf32>
    %150 = arith.addf %149, %148 : vector<8x96xf32>
    %151 = arith.divf %149, %150 : vector<8x96xf32>
    %152 = vector.extract_strided_slice %145 {offsets = [0, 96], sizes = [8, 32], strides = [1, 1]} : vector<8x128xf32> to vector<8x32xf32>
    %153 = math.tanh %152 : vector<8x32xf32>
    %154 = vector.extract_strided_slice %151 {offsets = [0, 0], sizes = [8, 32], strides = [1, 1]} : vector<8x96xf32> to vector<8x32xf32>
    %155 = vector.extract_strided_slice %151 {offsets = [0, 32], sizes = [8, 32], strides = [1, 1]} : vector<8x96xf32> to vector<8x32xf32>
    %156 = vector.extract_strided_slice %151 {offsets = [0, 64], sizes = [8, 32], strides = [1, 1]} : vector<8x96xf32> to vector<8x32xf32>
    %157 = arith.mulf %155, %115 : vector<8x32xf32>
    %158 = arith.mulf %154, %153 : vector<8x32xf32>
    %159 = arith.addf %157, %158 : vector<8x32xf32>
    %160 = math.tanh %159 : vector<8x32xf32>
    %161 = arith.mulf %156, %160 : vector<8x32xf32>
    %162 = tpu.concatenate %161, %138 in 1 : vector<8x32xf32>, vector<8x32xf32> -> vector<8x64xf32>
    %cst_42 = arith.constant dense<0.000000e+00> : vector<8x256xf32>
    %163 = tpu.matmul %162, %9, %cst_42 {dimension_numbers = #tpu.dot_dimension_numbers<[1], [0], [0], [1], [0, 0, 1, 1], [], []>} : vector<8x64xf32>, vector<64x256xf32>, vector<8x256xf32> -> vector<8x256xf32>
    %164 = vector.extract_strided_slice %163 {offsets = [0, 128], sizes = [8, 128], strides = [1, 1]} : vector<8x256xf32> to vector<8x128xf32>
    %165 = vector.broadcast %10 : vector<1x128xf32> to vector<8x128xf32>
    %166 = arith.addf %164, %165 : vector<8x128xf32>
    %167 = vector.extract_strided_slice %166 {offsets = [0, 0], sizes = [8, 96], strides = [1, 1]} : vector<8x128xf32> to vector<8x96xf32>
    %168 = arith.negf %167 : vector<8x96xf32>
    %169 = math.exp %168 : vector<8x96xf32>
    %cst_43 = arith.constant 1.000000e+00 : f32
    %170 = vector.broadcast %cst_43 : f32 to vector<8x96xf32>
    %171 = arith.addf %170, %169 : vector<8x96xf32>
    %172 = arith.divf %170, %171 : vector<8x96xf32>
    %173 = vector.extract_strided_slice %166 {offsets = [0, 96], sizes = [8, 32], strides = [1, 1]} : vector<8x128xf32> to vector<8x32xf32>
    %174 = math.tanh %173 : vector<8x32xf32>
    %175 = vector.extract_strided_slice %172 {offsets = [0, 0], sizes = [8, 32], strides = [1, 1]} : vector<8x96xf32> to vector<8x32xf32>
    %176 = vector.extract_strided_slice %172 {offsets = [0, 32], sizes = [8, 32], strides = [1, 1]} : vector<8x96xf32> to vector<8x32xf32>
    %177 = vector.extract_strided_slice %172 {offsets = [0, 64], sizes = [8, 32], strides = [1, 1]} : vector<8x96xf32> to vector<8x32xf32>
    %178 = arith.mulf %176, %136 : vector<8x32xf32>
    %179 = arith.mulf %175, %174 : vector<8x32xf32>
    %180 = arith.addf %178, %179 : vector<8x32xf32>
    %181 = math.tanh %180 : vector<8x32xf32>
    %182 = arith.mulf %177, %181 : vector<8x32xf32>
    %c0_44 = arith.constant 0 : index
    %c3_45 = arith.constant 3 : index
    %c0_46 = arith.constant 0 : index
    %183 = vector.load %arg10[%c0_44, %c3_45, %c0_46] : memref<8x8x32xf32, #tpu.memory_space<vmem>>, vector<8x1x32xf32>
    %184 = vector.shape_cast %183 : vector<8x1x32xf32> to vector<8x32xf32>
    %185 = vector.shape_cast %182 : vector<8x32xf32> to vector<8x1x32xf32>
    tpu.vector_store %arg10[%c0_44, %c3_45, %c0_46], %185 {strides = array<i32>} : memref<8x8x32xf32, #tpu.memory_space<vmem>>, vector<8x1x32xf32>,
    %186 = vector.extract_strided_slice %163 {offsets = [0, 0], sizes = [8, 128], strides = [1, 1]} : vector<8x256xf32> to vector<8x128xf32>
    %c0_47 = arith.constant 0 : index
    %c4 = arith.constant 4 : index
    %c0_48 = arith.constant 0 : index
    %187 = vector.load %arg9[%c0_47, %c4, %c0_48] : memref<8x8x128xf32, #tpu.memory_space<vmem>>, vector<8x1x128xf32>
    %188 = vector.shape_cast %187 : vector<8x1x128xf32> to vector<8x128xf32>
    %189 = arith.addf %186, %188 : vector<8x128xf32>
    %190 = vector.extract_strided_slice %189 {offsets = [0, 0], sizes = [8, 96], strides = [1, 1]} : vector<8x128xf32> to vector<8x96xf32>
    %191 = arith.negf %190 : vector<8x96xf32>
    %192 = math.exp %191 : vector<8x96xf32>
    %cst_49 = arith.constant 1.000000e+00 : f32
    %193 = vector.broadcast %cst_49 : f32 to vector<8x96xf32>
    %194 = arith.addf %193, %192 : vector<8x96xf32>
    %195 = arith.divf %193, %194 : vector<8x96xf32>
    %196 = vector.extract_strided_slice %189 {offsets = [0, 96], sizes = [8, 32], strides = [1, 1]} : vector<8x128xf32> to vector<8x32xf32>
    %197 = math.tanh %196 : vector<8x32xf32>
    %198 = vector.extract_strided_slice %195 {offsets = [0, 0], sizes = [8, 32], strides = [1, 1]} : vector<8x96xf32> to vector<8x32xf32>
    %199 = vector.extract_strided_slice %195 {offsets = [0, 32], sizes = [8, 32], strides = [1, 1]} : vector<8x96xf32> to vector<8x32xf32>
    %200 = vector.extract_strided_slice %195 {offsets = [0, 64], sizes = [8, 32], strides = [1, 1]} : vector<8x96xf32> to vector<8x32xf32>
    %201 = arith.mulf %199, %159 : vector<8x32xf32>
    %202 = arith.mulf %198, %197 : vector<8x32xf32>
    %203 = arith.addf %201, %202 : vector<8x32xf32>
    %204 = math.tanh %203 : vector<8x32xf32>
    %205 = arith.mulf %200, %204 : vector<8x32xf32>
    %206 = tpu.concatenate %205, %182 in 1 : vector<8x32xf32>, vector<8x32xf32> -> vector<8x64xf32>
    %cst_50 = arith.constant dense<0.000000e+00> : vector<8x256xf32>
    %207 = tpu.matmul %206, %9, %cst_50 {dimension_numbers = #tpu.dot_dimension_numbers<[1], [0], [0], [1], [0, 0, 1, 1], [], []>} : vector<8x64xf32>, vector<64x256xf32>, vector<8x256xf32> -> vector<8x256xf32>
    %208 = vector.extract_strided_slice %207 {offsets = [0, 128], sizes = [8, 128], strides = [1, 1]} : vector<8x256xf32> to vector<8x128xf32>
    %209 = vector.broadcast %10 : vector<1x128xf32> to vector<8x128xf32>
    %210 = arith.addf %208, %209 : vector<8x128xf32>
    %211 = vector.extract_strided_slice %210 {offsets = [0, 0], sizes = [8, 96], strides = [1, 1]} : vector<8x128xf32> to vector<8x96xf32>
    %212 = arith.negf %211 : vector<8x96xf32>
    %213 = math.exp %212 : vector<8x96xf32>
    %cst_51 = arith.constant 1.000000e+00 : f32
    %214 = vector.broadcast %cst_51 : f32 to vector<8x96xf32>
    %215 = arith.addf %214, %213 : vector<8x96xf32>
    %216 = arith.divf %214, %215 : vector<8x96xf32>
    %217 = vector.extract_strided_slice %210 {offsets = [0, 96], sizes = [8, 32], strides = [1, 1]} : vector<8x128xf32> to vector<8x32xf32>
    %218 = math.tanh %217 : vector<8x32xf32>
    %219 = vector.extract_strided_slice %216 {offsets = [0, 0], sizes = [8, 32], strides = [1, 1]} : vector<8x96xf32> to vector<8x32xf32>
    %220 = vector.extract_strided_slice %216 {offsets = [0, 32], sizes = [8, 32], strides = [1, 1]} : vector<8x96xf32> to vector<8x32xf32>
    %221 = vector.extract_strided_slice %216 {offsets = [0, 64], sizes = [8, 32], strides = [1, 1]} : vector<8x96xf32> to vector<8x32xf32>
    %222 = arith.mulf %220, %180 : vector<8x32xf32>
    %223 = arith.mulf %219, %218 : vector<8x32xf32>
    %224 = arith.addf %222, %223 : vector<8x32xf32>
    %225 = math.tanh %224 : vector<8x32xf32>
    %226 = arith.mulf %221, %225 : vector<8x32xf32>
    %c0_52 = arith.constant 0 : index
    %c4_53 = arith.constant 4 : index
    %c0_54 = arith.constant 0 : index
    %227 = vector.load %arg10[%c0_52, %c4_53, %c0_54] : memref<8x8x32xf32, #tpu.memory_space<vmem>>, vector<8x1x32xf32>
    %228 = vector.shape_cast %227 : vector<8x1x32xf32> to vector<8x32xf32>
    %229 = vector.shape_cast %226 : vector<8x32xf32> to vector<8x1x32xf32>
    tpu.vector_store %arg10[%c0_52, %c4_53, %c0_54], %229 {strides = array<i32>} : memref<8x8x32xf32, #tpu.memory_space<vmem>>, vector<8x1x32xf32>,
    %230 = vector.extract_strided_slice %207 {offsets = [0, 0], sizes = [8, 128], strides = [1, 1]} : vector<8x256xf32> to vector<8x128xf32>
    %c0_55 = arith.constant 0 : index
    %c5 = arith.constant 5 : index
    %c0_56 = arith.constant 0 : index
    %231 = vector.load %arg9[%c0_55, %c5, %c0_56] : memref<8x8x128xf32, #tpu.memory_space<vmem>>, vector<8x1x128xf32>
    %232 = vector.shape_cast %231 : vector<8x1x128xf32> to vector<8x128xf32>
    %233 = arith.addf %230, %232 : vector<8x128xf32>
    %234 = vector.extract_strided_slice %233 {offsets = [0, 0], sizes = [8, 96], strides = [1, 1]} : vector<8x128xf32> to vector<8x96xf32>
    %235 = arith.negf %234 : vector<8x96xf32>
    %236 = math.exp %235 : vector<8x96xf32>
    %cst_57 = arith.constant 1.000000e+00 : f32
    %237 = vector.broadcast %cst_57 : f32 to vector<8x96xf32>
    %238 = arith.addf %237, %236 : vector<8x96xf32>
    %239 = arith.divf %237, %238 : vector<8x96xf32>
    %240 = vector.extract_strided_slice %233 {offsets = [0, 96], sizes = [8, 32], strides = [1, 1]} : vector<8x128xf32> to vector<8x32xf32>
    %241 = math.tanh %240 : vector<8x32xf32>
    %242 = vector.extract_strided_slice %239 {offsets = [0, 0], sizes = [8, 32], strides = [1, 1]} : vector<8x96xf32> to vector<8x32xf32>
    %243 = vector.extract_strided_slice %239 {offsets = [0, 32], sizes = [8, 32], strides = [1, 1]} : vector<8x96xf32> to vector<8x32xf32>
    %244 = vector.extract_strided_slice %239 {offsets = [0, 64], sizes = [8, 32], strides = [1, 1]} : vector<8x96xf32> to vector<8x32xf32>
    %245 = arith.mulf %243, %203 : vector<8x32xf32>
    %246 = arith.mulf %242, %241 : vector<8x32xf32>
    %247 = arith.addf %245, %246 : vector<8x32xf32>
    %248 = math.tanh %247 : vector<8x32xf32>
    %249 = arith.mulf %244, %248 : vector<8x32xf32>
    %250 = tpu.concatenate %249, %226 in 1 : vector<8x32xf32>, vector<8x32xf32> -> vector<8x64xf32>
    %cst_58 = arith.constant dense<0.000000e+00> : vector<8x256xf32>
    %251 = tpu.matmul %250, %9, %cst_58 {dimension_numbers = #tpu.dot_dimension_numbers<[1], [0], [0], [1], [0, 0, 1, 1], [], []>} : vector<8x64xf32>, vector<64x256xf32>, vector<8x256xf32> -> vector<8x256xf32>
    %252 = vector.extract_strided_slice %251 {offsets = [0, 128], sizes = [8, 128], strides = [1, 1]} : vector<8x256xf32> to vector<8x128xf32>
    %253 = vector.broadcast %10 : vector<1x128xf32> to vector<8x128xf32>
    %254 = arith.addf %252, %253 : vector<8x128xf32>
    %255 = vector.extract_strided_slice %254 {offsets = [0, 0], sizes = [8, 96], strides = [1, 1]} : vector<8x128xf32> to vector<8x96xf32>
    %256 = arith.negf %255 : vector<8x96xf32>
    %257 = math.exp %256 : vector<8x96xf32>
    %cst_59 = arith.constant 1.000000e+00 : f32
    %258 = vector.broadcast %cst_59 : f32 to vector<8x96xf32>
    %259 = arith.addf %258, %257 : vector<8x96xf32>
    %260 = arith.divf %258, %259 : vector<8x96xf32>
    %261 = vector.extract_strided_slice %254 {offsets = [0, 96], sizes = [8, 32], strides = [1, 1]} : vector<8x128xf32> to vector<8x32xf32>
    %262 = math.tanh %261 : vector<8x32xf32>
    %263 = vector.extract_strided_slice %260 {offsets = [0, 0], sizes = [8, 32], strides = [1, 1]} : vector<8x96xf32> to vector<8x32xf32>
    %264 = vector.extract_strided_slice %260 {offsets = [0, 32], sizes = [8, 32], strides = [1, 1]} : vector<8x96xf32> to vector<8x32xf32>
    %265 = vector.extract_strided_slice %260 {offsets = [0, 64], sizes = [8, 32], strides = [1, 1]} : vector<8x96xf32> to vector<8x32xf32>
    %266 = arith.mulf %264, %224 : vector<8x32xf32>
    %267 = arith.mulf %263, %262 : vector<8x32xf32>
    %268 = arith.addf %266, %267 : vector<8x32xf32>
    %269 = math.tanh %268 : vector<8x32xf32>
    %270 = arith.mulf %265, %269 : vector<8x32xf32>
    %c0_60 = arith.constant 0 : index
    %c5_61 = arith.constant 5 : index
    %c0_62 = arith.constant 0 : index
    %271 = vector.load %arg10[%c0_60, %c5_61, %c0_62] : memref<8x8x32xf32, #tpu.memory_space<vmem>>, vector<8x1x32xf32>
    %272 = vector.shape_cast %271 : vector<8x1x32xf32> to vector<8x32xf32>
    %273 = vector.shape_cast %270 : vector<8x32xf32> to vector<8x1x32xf32>
    tpu.vector_store %arg10[%c0_60, %c5_61, %c0_62], %273 {strides = array<i32>} : memref<8x8x32xf32, #tpu.memory_space<vmem>>, vector<8x1x32xf32>,
    %274 = vector.extract_strided_slice %251 {offsets = [0, 0], sizes = [8, 128], strides = [1, 1]} : vector<8x256xf32> to vector<8x128xf32>
    %c0_63 = arith.constant 0 : index
    %c6 = arith.constant 6 : index
    %c0_64 = arith.constant 0 : index
    %275 = vector.load %arg9[%c0_63, %c6, %c0_64] : memref<8x8x128xf32, #tpu.memory_space<vmem>>, vector<8x1x128xf32>
    %276 = vector.shape_cast %275 : vector<8x1x128xf32> to vector<8x128xf32>
    %277 = arith.addf %274, %276 : vector<8x128xf32>
    %278 = vector.extract_strided_slice %277 {offsets = [0, 0], sizes = [8, 96], strides = [1, 1]} : vector<8x128xf32> to vector<8x96xf32>
    %279 = arith.negf %278 : vector<8x96xf32>
    %280 = math.exp %279 : vector<8x96xf32>
    %cst_65 = arith.constant 1.000000e+00 : f32
    %281 = vector.broadcast %cst_65 : f32 to vector<8x96xf32>
    %282 = arith.addf %281, %280 : vector<8x96xf32>
    %283 = arith.divf %281, %282 : vector<8x96xf32>
    %284 = vector.extract_strided_slice %277 {offsets = [0, 96], sizes = [8, 32], strides = [1, 1]} : vector<8x128xf32> to vector<8x32xf32>
    %285 = math.tanh %284 : vector<8x32xf32>
    %286 = vector.extract_strided_slice %283 {offsets = [0, 0], sizes = [8, 32], strides = [1, 1]} : vector<8x96xf32> to vector<8x32xf32>
    %287 = vector.extract_strided_slice %283 {offsets = [0, 32], sizes = [8, 32], strides = [1, 1]} : vector<8x96xf32> to vector<8x32xf32>
    %288 = vector.extract_strided_slice %283 {offsets = [0, 64], sizes = [8, 32], strides = [1, 1]} : vector<8x96xf32> to vector<8x32xf32>
    %289 = arith.mulf %287, %247 : vector<8x32xf32>
    %290 = arith.mulf %286, %285 : vector<8x32xf32>
    %291 = arith.addf %289, %290 : vector<8x32xf32>
    %292 = math.tanh %291 : vector<8x32xf32>
    %293 = arith.mulf %288, %292 : vector<8x32xf32>
    %294 = tpu.concatenate %293, %270 in 1 : vector<8x32xf32>, vector<8x32xf32> -> vector<8x64xf32>
    %cst_66 = arith.constant dense<0.000000e+00> : vector<8x256xf32>
    %295 = tpu.matmul %294, %9, %cst_66 {dimension_numbers = #tpu.dot_dimension_numbers<[1], [0], [0], [1], [0, 0, 1, 1], [], []>} : vector<8x64xf32>, vector<64x256xf32>, vector<8x256xf32> -> vector<8x256xf32>
    %296 = vector.extract_strided_slice %295 {offsets = [0, 128], sizes = [8, 128], strides = [1, 1]} : vector<8x256xf32> to vector<8x128xf32>
    %297 = vector.broadcast %10 : vector<1x128xf32> to vector<8x128xf32>
    %298 = arith.addf %296, %297 : vector<8x128xf32>
    %299 = vector.extract_strided_slice %298 {offsets = [0, 0], sizes = [8, 96], strides = [1, 1]} : vector<8x128xf32> to vector<8x96xf32>
    %300 = arith.negf %299 : vector<8x96xf32>
    %301 = math.exp %300 : vector<8x96xf32>
    %cst_67 = arith.constant 1.000000e+00 : f32
    %302 = vector.broadcast %cst_67 : f32 to vector<8x96xf32>
    %303 = arith.addf %302, %301 : vector<8x96xf32>
    %304 = arith.divf %302, %303 : vector<8x96xf32>
    %305 = vector.extract_strided_slice %298 {offsets = [0, 96], sizes = [8, 32], strides = [1, 1]} : vector<8x128xf32> to vector<8x32xf32>
    %306 = math.tanh %305 : vector<8x32xf32>
    %307 = vector.extract_strided_slice %304 {offsets = [0, 0], sizes = [8, 32], strides = [1, 1]} : vector<8x96xf32> to vector<8x32xf32>
    %308 = vector.extract_strided_slice %304 {offsets = [0, 32], sizes = [8, 32], strides = [1, 1]} : vector<8x96xf32> to vector<8x32xf32>
    %309 = vector.extract_strided_slice %304 {offsets = [0, 64], sizes = [8, 32], strides = [1, 1]} : vector<8x96xf32> to vector<8x32xf32>
    %310 = arith.mulf %308, %268 : vector<8x32xf32>
    %311 = arith.mulf %307, %306 : vector<8x32xf32>
    %312 = arith.addf %310, %311 : vector<8x32xf32>
    %313 = math.tanh %312 : vector<8x32xf32>
    %314 = arith.mulf %309, %313 : vector<8x32xf32>
    %c0_68 = arith.constant 0 : index
    %c6_69 = arith.constant 6 : index
    %c0_70 = arith.constant 0 : index
    %315 = vector.load %arg10[%c0_68, %c6_69, %c0_70] : memref<8x8x32xf32, #tpu.memory_space<vmem>>, vector<8x1x32xf32>
    %316 = vector.shape_cast %315 : vector<8x1x32xf32> to vector<8x32xf32>
    %317 = vector.shape_cast %314 : vector<8x32xf32> to vector<8x1x32xf32>
    tpu.vector_store %arg10[%c0_68, %c6_69, %c0_70], %317 {strides = array<i32>} : memref<8x8x32xf32, #tpu.memory_space<vmem>>, vector<8x1x32xf32>,
    %318 = vector.extract_strided_slice %295 {offsets = [0, 0], sizes = [8, 128], strides = [1, 1]} : vector<8x256xf32> to vector<8x128xf32>
    %c0_71 = arith.constant 0 : index
    %c7 = arith.constant 7 : index
    %c0_72 = arith.constant 0 : index
    %319 = vector.load %arg9[%c0_71, %c7, %c0_72] : memref<8x8x128xf32, #tpu.memory_space<vmem>>, vector<8x1x128xf32>
    %320 = vector.shape_cast %319 : vector<8x1x128xf32> to vector<8x128xf32>
    %321 = arith.addf %318, %320 : vector<8x128xf32>
    %322 = vector.extract_strided_slice %321 {offsets = [0, 0], sizes = [8, 96], strides = [1, 1]} : vector<8x128xf32> to vector<8x96xf32>
    %323 = arith.negf %322 : vector<8x96xf32>
    %324 = math.exp %323 : vector<8x96xf32>
    %cst_73 = arith.constant 1.000000e+00 : f32
    %325 = vector.broadcast %cst_73 : f32 to vector<8x96xf32>
    %326 = arith.addf %325, %324 : vector<8x96xf32>
    %327 = arith.divf %325, %326 : vector<8x96xf32>
    %328 = vector.extract_strided_slice %321 {offsets = [0, 96], sizes = [8, 32], strides = [1, 1]} : vector<8x128xf32> to vector<8x32xf32>
    %329 = math.tanh %328 : vector<8x32xf32>
    %330 = vector.extract_strided_slice %327 {offsets = [0, 0], sizes = [8, 32], strides = [1, 1]} : vector<8x96xf32> to vector<8x32xf32>
    %331 = vector.extract_strided_slice %327 {offsets = [0, 32], sizes = [8, 32], strides = [1, 1]} : vector<8x96xf32> to vector<8x32xf32>
    %332 = vector.extract_strided_slice %327 {offsets = [0, 64], sizes = [8, 32], strides = [1, 1]} : vector<8x96xf32> to vector<8x32xf32>
    %333 = arith.mulf %331, %291 : vector<8x32xf32>
    %334 = arith.mulf %330, %329 : vector<8x32xf32>
    %335 = arith.addf %333, %334 : vector<8x32xf32>
    %336 = math.tanh %335 : vector<8x32xf32>
    %337 = arith.mulf %332, %336 : vector<8x32xf32>
    %338 = tpu.concatenate %337, %314 in 1 : vector<8x32xf32>, vector<8x32xf32> -> vector<8x64xf32>
    %cst_74 = arith.constant dense<0.000000e+00> : vector<8x256xf32>
    %339 = tpu.matmul %338, %9, %cst_74 {dimension_numbers = #tpu.dot_dimension_numbers<[1], [0], [0], [1], [0, 0, 1, 1], [], []>} : vector<8x64xf32>, vector<64x256xf32>, vector<8x256xf32> -> vector<8x256xf32>
    %340 = vector.extract_strided_slice %339 {offsets = [0, 128], sizes = [8, 128], strides = [1, 1]} : vector<8x256xf32> to vector<8x128xf32>
    %341 = vector.broadcast %10 : vector<1x128xf32> to vector<8x128xf32>
    %342 = arith.addf %340, %341 : vector<8x128xf32>
    %343 = vector.extract_strided_slice %342 {offsets = [0, 0], sizes = [8, 96], strides = [1, 1]} : vector<8x128xf32> to vector<8x96xf32>
    %344 = arith.negf %343 : vector<8x96xf32>
    %345 = math.exp %344 : vector<8x96xf32>
    %cst_75 = arith.constant 1.000000e+00 : f32
    %346 = vector.broadcast %cst_75 : f32 to vector<8x96xf32>
    %347 = arith.addf %346, %345 : vector<8x96xf32>
    %348 = arith.divf %346, %347 : vector<8x96xf32>
    %349 = vector.extract_strided_slice %342 {offsets = [0, 96], sizes = [8, 32], strides = [1, 1]} : vector<8x128xf32> to vector<8x32xf32>
    %350 = math.tanh %349 : vector<8x32xf32>
    %351 = vector.extract_strided_slice %348 {offsets = [0, 0], sizes = [8, 32], strides = [1, 1]} : vector<8x96xf32> to vector<8x32xf32>
    %352 = vector.extract_strided_slice %348 {offsets = [0, 32], sizes = [8, 32], strides = [1, 1]} : vector<8x96xf32> to vector<8x32xf32>
    %353 = vector.extract_strided_slice %348 {offsets = [0, 64], sizes = [8, 32], strides = [1, 1]} : vector<8x96xf32> to vector<8x32xf32>
    %354 = arith.mulf %352, %312 : vector<8x32xf32>
    %355 = arith.mulf %351, %350 : vector<8x32xf32>
    %356 = arith.addf %354, %355 : vector<8x32xf32>
    %357 = math.tanh %356 : vector<8x32xf32>
    %358 = arith.mulf %353, %357 : vector<8x32xf32>
    %c0_76 = arith.constant 0 : index
    %c7_77 = arith.constant 7 : index
    %c0_78 = arith.constant 0 : index
    %359 = vector.load %arg10[%c0_76, %c7_77, %c0_78] : memref<8x8x32xf32, #tpu.memory_space<vmem>>, vector<8x1x32xf32>
    %360 = vector.shape_cast %359 : vector<8x1x32xf32> to vector<8x32xf32>
    %361 = vector.shape_cast %358 : vector<8x32xf32> to vector<8x1x32xf32>
    tpu.vector_store %arg10[%c0_76, %c7_77, %c0_78], %361 {strides = array<i32>} : memref<8x8x32xf32, #tpu.memory_space<vmem>>, vector<8x1x32xf32>,
    %c0_79 = arith.constant 0 : index
    %c0_80 = arith.constant 0 : index
    %c0_81 = arith.constant 0 : index
    %362 = vector.load %arg10[%c0_79, %c0_80, %c0_81] : memref<8x8x32xf32, #tpu.memory_space<vmem>>, vector<8x8x32xf32>
    %363 = vector.shape_cast %362 : vector<8x8x32xf32> to vector<64x32xf32>
    %c0_82 = arith.constant 0 : index
    %c0_83 = arith.constant 0 : index
    %364 = vector.load %arg6[%c0_82, %c0_83] : memref<32x10xf32, #tpu.memory_space<vmem>>, vector<32x10xf32>
    %cst_84 = arith.constant dense<0.000000e+00> : vector<64x10xf32>
    %365 = tpu.matmul %363, %364, %cst_84 {dimension_numbers = #tpu.dot_dimension_numbers<[1], [0], [0], [1], [0, 0, 1, 1], [], []>} : vector<64x32xf32>, vector<32x10xf32>, vector<64x10xf32> -> vector<64x10xf32>
    %c0_85 = arith.constant 0 : index
    %c0_86 = arith.constant 0 : index
    %366 = vector.load %arg7[%c0_85, %c0_86] : memref<1x10xf32, #tpu.memory_space<vmem>>, vector<1x10xf32>
    %367 = vector.broadcast %366 : vector<1x10xf32> to vector<64x10xf32>
    %368 = arith.addf %365, %367 : vector<64x10xf32>
    %369 = vector.shape_cast %368 : vector<64x10xf32> to vector<8x8x10xf32>
    %c0_87 = arith.constant 0 : index
    %c0_88 = arith.constant 0 : index
    %c0_89 = arith.constant 0 : index
    %370 = vector.load %arg8[%c0_87, %c0_88, %c0_89] : memref<8x8x10xf32, #tpu.memory_space<vmem>>, vector<8x8x10xf32>
    tpu.vector_store %arg8[%c0_87, %c0_88, %c0_89], %369 {strides = array<i32>} : memref<8x8x10xf32, #tpu.memory_space<vmem>>, vector<8x8x10xf32>,
    return
  }
  func.func @transform_0(%arg0: i32) -> (i32, i32, i32) {
    %c0_i32 = arith.constant 0 : i32
    %c0_i32_0 = arith.constant 0 : i32
    %c0_i32_1 = arith.constant 0 : i32
    return %arg0, %c0_i32, %c0_i32_0 : i32, i32, i32
  }
  func.func @transform_1(%arg0: i32) -> (i32, i32) {
    %c0_i32 = arith.constant 0 : i32
    %c0_i32_0 = arith.constant 0 : i32
    %c0_i32_1 = arith.constant 0 : i32
    return %c0_i32, %c0_i32_0 : i32, i32
  }
  func.func @transform_2(%arg0: i32) -> (i32, i32) {
    %c0_i32 = arith.constant 0 : i32
    %c0_i32_0 = arith.constant 0 : i32
    %c0_i32_1 = arith.constant 0 : i32
    return %c0_i32, %c0_i32_0 : i32, i32
  }
  func.func @transform_3(%arg0: i32) -> (i32, i32) {
    %c0_i32 = arith.constant 0 : i32
    %c0_i32_0 = arith.constant 0 : i32
    %c0_i32_1 = arith.constant 0 : i32
    return %c0_i32, %c0_i32_0 : i32, i32
  }
  func.func @transform_4(%arg0: i32) -> (i32, i32) {
    %c0_i32 = arith.constant 0 : i32
    %c0_i32_0 = arith.constant 0 : i32
    %c0_i32_1 = arith.constant 0 : i32
    return %c0_i32, %c0_i32_0 : i32, i32
  }
  func.func @transform_5(%arg0: i32) -> (i32, i32) {
    %c0_i32 = arith.constant 0 : i32
    %c0_i32_0 = arith.constant 0 : i32
    %c0_i32_1 = arith.constant 0 : i32
    return %c0_i32, %c0_i32_0 : i32, i32
  }
  func.func @transform_6(%arg0: i32) -> (i32, i32) {
    %c0_i32 = arith.constant 0 : i32
    %c0_i32_0 = arith.constant 0 : i32
    %c0_i32_1 = arith.constant 0 : i32
    return %c0_i32, %c0_i32_0 : i32, i32
  }
  func.func @transform_7(%arg0: i32) -> (i32, i32, i32) {
    %c0_i32 = arith.constant 0 : i32
    %c0_i32_0 = arith.constant 0 : i32
    %c0_i32_1 = arith.constant 0 : i32
    return %arg0, %c0_i32, %c0_i32_0 : i32, i32, i32
  }
}

</mosaic_0001>

<bundles_post_ra>
// kernel: lstm_model_forward.1
= control target key start
LH: loop header
LB: loop body
LE: loop exit
PB: predicated region body
PF: predicated region fallthrough
CT: control target
= control target key end

     0   :  { %vm70_vm0 = vcmask 1043456   ;;  %vm45_vm1 = vcmask 228352   ;;  %vm3237_vm2 = vmmov 1   ;;  %vm413_vm4 = vcmask 1041409   ;;  %s3241_s11 = smov 96   ;;  %s4225_s1 = inlined_call_operand.vmem [shape: f32[28,128], index: 1, kind: input, shape index: {}]   ;;  %s4226_s0 = inlined_call_operand.vmem [shape: f32[8,8,28], index: 0, kind: input, shape index: {}]   ;;  %s4227_s2 = inlined_call_operand.vmem [shape: f32[1,128], index: 2, kind: input, shape index: {}]   ;;  %s4228_s3 = inlined_call_operand.vmem [shape: f32[64,256], index: 3, kind: input, shape index: {}]   ;;  %s4229_s4 = inlined_call_operand.vmem [shape: f32[1,128], index: 4, kind: input, shape index: {}]   ;;  %s4230_s5 = inlined_call_operand.vmem [shape: f32[32,10], index: 5, kind: input, shape index: {}]   ;;  %s4231_s6 = inlined_call_operand.vmem [shape: f32[1,10], index: 6, kind: input, shape index: {}]   ;;  %s4232_s7 = inlined_call_operand.vmem [shape: f32[8,8,10], index: 7, kind: output, shape index: {}]  }
   0x1   :  { %v34_v0 = vld [vmem:[%s4225_s1] sm:$0xff]  ;;  %v35_v1 = vld [vmem:[%s4225_s1 + $0x8] sm:$0xff]  ;;  %v36_v2 = vld [vmem:[%s4225_s1 + $0x10] sm:$0xff]  ;;  %vm416_vm5 = vcmask 1042434   ;;  %vm419_vm6 = vcmask 1043459   ;;  %vm422_vm7 = vcmask 1044484  }
   0x2   :  { %v2896_v3 = vpack.c.bf16 %v35_v1, %v34_v0  ;;  %v37_v4 = vld [vmem:[%s4225_s1 + $0x18] sm:$0xf]  ;;  %v26_v5 = vld [vmem:[%s4226_s0] sm:$0xff]  ;;  %vm2901_vm3 = vmpackc.low %vm70_vm0, %vm3237_vm2  ;;  %vm425_vm8 = vcmask 1045509   ;;  %vm428_vm9 = vcmask 1046534   ;;  %vm431_vm10 = vcmask 1047559  }
   0x3   :  { %v2900_v6 = vpack.c.bf16 %v37_v4, %v36_v2  ;;  %2864 = vmatprep.mubr.msk.f32.mxu0 %vm45_vm1, %v26_v5  ;;  %v27_v7 = vld [vmem:[%s4226_s0 + $0x8] sm:$0xff]  ;;  %v28_v8 = vld [vmem:[%s4226_s0 + $0x10] sm:$0xff]  ;;  %v29_v9 = vld [vmem:[%s4226_s0 + $0x18] sm:$0xff]  ;;  %vm436_vm11 = vcmask 261120   ;;  %vm438_vm12 = vcmask 523264   ;;  %vm650_vm13 = vcmask 253952  }
   0x4   :  { %2897 = vmatprep.subr.bf16.mxu0 %v2896_v3  ;;  %v30_v10 = vld [vmem:[%s4226_s0 + $0x20] sm:$0xff]  ;;  %v31_v11 = vld [vmem:[%s4226_s0 + $0x28] sm:$0xff]  ;;  %v32_v12 = vld [vmem:[%s4226_s0 + $0x30] sm:$0xff]  ;;  %vm2768_vm14 = vcmask 80896  }
   0x5   :  { %2899 = vmatpush3.bf16.msra.mxu0 %v2896_v3  ;;  %v33_v13 = vld [vmem:[%s4226_s0 + $0x38] sm:$0xff]  ;;  %v2781_v14 = vld [vmem:[%s4227_s2] ss:$0 sm:$0xff]  ;;  %s3238_s0 = smov 32  }
   0x6   :  { %2902 = vmatprep.subr.msk.bf16.mxu0 %vm2901_vm3, %v2900_v6 }
   0x9   :  { %2905 = vmatpush3.bf16.msk.msra.mxu0 %vm2901_vm3, %v2900_v6 }
   0xc   :  { %2865 = vmatmul.mubr.msk.f32.vlgmr.msra.gmra.mrb[0].mxu0 %vm45_vm1, %v27_v7 }
   0xd   :  { %2867 = vmatprep.mubr.msk.f32.mxu0 %vm45_vm1, %v28_v8 }
  0x10   :  { %2868 = vmatmul.mubr.msk.f32.gmra.mrb[2].mxu0 %vm45_vm1, %v29_v9 }
  0x11   :  { %2870 = vmatprep.mubr.msk.f32.mxu0 %vm45_vm1, %v30_v10 }
  0x14   :  { %2871 = vmatmul.mubr.msk.f32.gmra.mrb[4].mxu0 %vm45_vm1, %v31_v11 }
  0x15   :  { %2873 = vmatprep.mubr.msk.f32.mxu0 %vm45_vm1, %v32_v12 }
  0x18   :  { %2874 = vmatmul.mubr.msk.f32.gmra.mrb[6].mxu0 %vm45_vm1, %v33_v13 }
  0xdf   :  { %v2866_v15 = vpop.f32.mrb[0].mxu0 }
  0xe0   :  { %v146_v16 = vadd.f32 %v2866_v15, %v2781_v14  ;;  %v140_v17 = vpop.f32.mrb[1].mxu0 }
  0xe1   :  { %v141_v18 = vadd.f32 %v2781_v14, %v140_v17 }
  0xe2   :  { %180 = vst [vmem:[#allocation2 + $0x8] sm:$0xff] %v146_v16 }
  0xe3   :  { %179 = vst [vmem:[#allocation2] sm:$0xff] %v141_v18  ;;  %v2869_v19 = vpop.f32.mrb[2].mxu0 }
  0xe4   :  { %v156_v20 = vadd.f32 %v2869_v19, %v2781_v14  ;;  %v150_v21 = vpop.f32.mrb[3].mxu0 }
  0xe5   :  { %v151_v22 = vadd.f32 %v2781_v14, %v150_v21 }
  0xe6   :  { %182 = vst [vmem:[#allocation2 + $0x18] sm:$0xff] %v156_v20 }
  0xe7   :  { %181 = vst [vmem:[#allocation2 + $0x10] sm:$0xff] %v151_v22  ;;  %v2872_v23 = vpop.f32.mrb[4].mxu0 }
  0xe8   :  { %v166_v24 = vadd.f32 %v2872_v23, %v2781_v14  ;;  %v160_v25 = vpop.f32.mrb[5].mxu0 }
  0xe9   :  { %v161_v26 = vadd.f32 %v2781_v14, %v160_v25  ;;  %v205_v27 = vld [vmem:[#allocation2 + $0x8] sm:$0x1] }
  0xea   :  { %184 = vst [vmem:[#allocation2 + $0x28] sm:$0xff] %v166_v24  ;;  %3052 = vtanh.f32 %v205_v27  ;;  %v204_v28 = vld [vmem:[#allocation2] sm:$0x1]  ;;  %v2792_v47 = vmul.f32 -1.442695, %v205_v27 }
  0xeb   :  { %183 = vst [vmem:[#allocation2 + $0x20] sm:$0xff] %v161_v26  ;;  %v2875_v29 = vpop.f32.mrb[6].mxu0  ;;  %3054 = vtanh.f32 %v204_v28  ;;  %v2791_v48 = vmul.f32 -1.442695, %v204_v28 }
  0xec   :  { %v176_v30 = vadd.f32 %v2875_v29, %v2781_v14  ;;  %v170_v31 = vpop.f32.mrb[7].mxu0 }
  0xed   :  { %v171_v32 = vadd.f32 %v2781_v14, %v170_v31  ;;  %v207_v33 = vld [vmem:[#allocation2 + $0x18] sm:$0x1] }
  0xee   :  { %186 = vst [vmem:[#allocation2 + $0x38] sm:$0xff] %v176_v30  ;;  %v206_v34 = vld [vmem:[#allocation2 + $0x10] sm:$0x1]  ;;  %3056 = vtanh.f32 %v207_v33  ;;  %v2794_v49 = vmul.f32 -1.442695, %v207_v33 }
  0xef   :  { %185 = vst [vmem:[#allocation2 + $0x30] sm:$0xff] %v171_v32  ;;  %3058 = vtanh.f32 %v206_v34  ;;  %v2793_v50 = vmul.f32 -1.442695, %v206_v34 }
  0xf1   :  { %v209_v35 = vld [vmem:[#allocation2 + $0x28] sm:$0x1] }
  0xf2   :  { %v208_v36 = vld [vmem:[#allocation2 + $0x20] sm:$0x1]  ;;  %3060 = vtanh.f32 %v209_v35  ;;  %v2796_v52 = vmul.f32 -1.442695, %v209_v35 }
  0xf3   :  { %3062 = vtanh.f32 %v208_v36  ;;  %v2795_v51 = vmul.f32 -1.442695, %v208_v36 }
  0xf4   :  { %v3053_v37 = vpop.eup %3052 }
  0xf5   :  { %v3055_v38 = vpop.eup %3054  ;;  %286 = vrot.lane.b32.xlu0 %v3053_v37, %s3238_s0  ;;  %v211_v39 = vld [vmem:[#allocation2 + $0x38] sm:$0x1] }
  0xf6   :  { %284 = vrot.lane.b32.xlu1 %v3055_v38, %s3238_s0  ;;  %v210_v40 = vld [vmem:[#allocation2 + $0x30] sm:$0x1]  ;;  %3064 = vtanh.f32 %v211_v39  ;;  %v2798_v55 = vmul.f32 -1.442695, %v211_v39 }
  0xf7   :  { %3066 = vtanh.f32 %v210_v40  ;;  %v2797_v53 = vmul.f32 -1.442695, %v210_v40 }
  0xf8   :  { %v3057_v41 = vpop.eup %3056  ;;  %3068 = vpow2.f32 %v2792_v47 }
  0xf9   :  { %v3059_v42 = vpop.eup %3058  ;;  %3070 = vpow2.f32 %v2791_v48 }
  0xfa   :  { %288 = vrot.lane.b32.xlu0 %v3059_v42, %s3238_s0  ;;  %290 = vrot.lane.b32.xlu1 %v3057_v41, %s3238_s0  ;;  %3072 = vpow2.f32 %v2794_v49 }
  0xfb   :  { %3074 = vpow2.f32 %v2793_v50 }
  0xfc   :  { %v3061_v43 = vpop.eup %3060  ;;  %3076 = vpow2.f32 %v2795_v51 }
  0xfd   :  { %v3063_v44 = vpop.eup %3062  ;;  %3078 = vpow2.f32 %v2796_v52 }
  0xfe   :  { %292 = vrot.lane.b32.xlu0 %v3063_v44, %s3238_s0  ;;  %294 = vrot.lane.b32.xlu1 %v3061_v43, %s3238_s0  ;;  %3080 = vpow2.f32 %v2797_v53 }
  0xff   :  { %3082 = vpow2.f32 %v2798_v55 }
 0x100   :  { %v3065_v45 = vpop.eup %3064 }
 0x101   :  { %v3067_v46 = vpop.eup %3066 }
 0x102   :  { %296 = vrot.lane.b32.xlu0 %v3067_v46, %s3238_s0  ;;  %298 = vrot.lane.b32.xlu1 %v3065_v45, %s3238_s0  ;;  %v3069_v54 = vpop.eup %3068 }
 0x103   :  { %v237_v56 = vadd.f32 1.0, %v3069_v54  ;;  %v3071_v57 = vpop.eup %3070 }
 0x104   :  { %v3073_v58 = vpop.eup %3072  ;;  %v236_v59 = vadd.f32 1.0, %v3071_v57 }
 0x105   :  { %3084 = vrcp.f32 %v237_v56  ;;  %v3075_v60 = vpop.eup %3074  ;;  %v239_v61 = vadd.f32 1.0, %v3073_v58 }
 0x106   :  { %v3077_v62 = vpop.eup %3076  ;;  %3086 = vrcp.f32 %v236_v59  ;;  %v238_v63 = vadd.f32 1.0, %v3075_v60 }
 0x107   :  { %v3079_v0 = vpop.eup %3078  ;;  %3088 = vrcp.f32 %v239_v61  ;;  %v240_v1 = vadd.f32 1.0, %v3077_v62 }
 0x108   :  { %v3081_v2 = vpop.eup %3080  ;;  %3090 = vrcp.f32 %v238_v63  ;;  %v241_v3 = vadd.f32 1.0, %v3079_v0 }
 0x109   :  { %v3083_v4 = vpop.eup %3082  ;;  %3092 = vrcp.f32 %v240_v1  ;;  %v242_v5 = vadd.f32 1.0, %v3081_v2 }
 0x10a   :  { %3094 = vrcp.f32 %v241_v3  ;;  %v243_v10 = vadd.f32 1.0, %v3083_v4 }
 0x10b   :  { %3096 = vrcp.f32 %v242_v5 }
 0x10c   :  { %3098 = vrcp.f32 %v243_v10 }
 0x10f   :  { %v3338_v6 = vpop.eup %3084 }
 0x110   :  { %v3342_v11 = vpop.eup %3086  ;;  %v269_v31 = vmul.f32 0.0, %v3338_v6 }
 0x111   :  { %v3344_v12 = vpop.eup %3088  ;;  %v268_v34 = vmul.f32 0.0, %v3342_v11 }
 0x112   :  { %v3349_v17 = vpop.eup %3090  ;;  %v271_v36 = vmul.f32 0.0, %v3344_v12 }
 0x113   :  { %v3352_v18 = vpop.eup %3092  ;;  %v270_v42 = vmul.f32 0.0, %v3349_v17 }
 0x114   :  { %v3356_v23 = vpop.eup %3094  ;;  %v272_v43 = vmul.f32 0.0, %v3352_v18 }
 0x115   :  { %v3360_v24 = vpop.eup %3096  ;;  %v273_v49 = vmul.f32 0.0, %v3356_v23 }
 0x116   :  { %v3366_v29 = vpop.eup %3098  ;;  %v274_v50 = vmul.f32 0.0, %v3360_v24 }
 0x117   :  { %v275_v60 = vmul.f32 0.0, %v3366_v29 }
 0x167   :  { %v287_v7 = vpop.permute.xlu0 %286 }
 0x168   :  { %v309_v8 = vmul.f32 %v3338_v6, %v287_v7  ;;  %v285_v9 = vpop.permute.xlu1 %284 }
 0x169   :  { %v308_v13 = vmul.f32 %v3342_v11, %v285_v9 }
 0x16a   :  { %326 = vrot.lane.b32.xlu0 %v309_v8, %s3238_s0 }
 0x16c   :  { %v289_v14 = vpop.permute.xlu0 %288  ;;  %v291_v15 = vpop.permute.xlu1 %290 }
 0x16d   :  { %v311_v16 = vmul.f32 %v3344_v12, %v291_v15  ;;  %v310_v21 = vmul.f32 %v3349_v17, %v289_v14  ;;  %v190_v14 = vld [vmem:[%s4228_s3 + $0x18] sm:$0xff]  ;;  %v187_v15 = vld [vmem:[%s4228_s3] sm:$0xff] }
 0x16e   :  { %324 = vrot.lane.b32.xlu0 %v308_v13, %s3238_s0  ;;  %v188_v13 = vld [vmem:[%s4228_s3 + $0x8] sm:$0xff] }
 0x16f   :  { %330 = vrot.lane.b32.xlu1 %v311_v16, %s3238_s0  ;;  %v3401_v16 = vpack.c.bf16 %v190_v14, %v188_v13  ;;  %v659_v13 = vld [vmem:[#allocation2 + $0x1] sm:$0x1]  ;;  %v662_v14 = vld [vmem:[#allocation2 + $0x19] sm:$0x1] }
 0x170   :  { %v293_v19 = vpop.permute.xlu0 %292  ;;  %v295_v20 = vpop.permute.xlu1 %294 }
 0x171   :  { %v312_v22 = vmul.f32 %v3352_v18, %v293_v19  ;;  %v313_v26 = vmul.f32 %v3356_v23, %v295_v20  ;;  %v189_v19 = vld [vmem:[%s4228_s3 + $0x10] sm:$0xff]  ;;  %v192_v20 = vld [vmem:[%s4228_s3 + $0x28] sm:$0xff]  ;;  %2907 = vmatprep.subr.bf16.mxu1 %v3401_v16  ;;  %2923 = vmatprep.subr.bf16.mxu0 %v3401_v16 }
 0x173   :  { %328 = vrot.lane.b32.xlu1 %v310_v21, %s3238_s0  ;;  %332 = vrot.lane.b32.xlu0 %v312_v22, %s3238_s0  ;;  %v194_v21 = vld [vmem:[%s4228_s3 + $0x38] sm:$0xff] }
 0x174   :  { %v297_v25 = vpop.permute.xlu0 %296  ;;  %v299_v28 = vpop.permute.xlu1 %298 }
 0x175   :  { %v314_v27 = vmul.f32 %v3360_v24, %v297_v25  ;;  %v315_v30 = vmul.f32 %v3366_v29, %v299_v28  ;;  %v3412_v25 = vpack.c.bf16 %v189_v19, %v187_v15  ;;  %v193_v28 = vld [vmem:[%s4228_s3 + $0x30] sm:$0xff]  ;;  %v663_v19 = vld [vmem:[#allocation2 + $0x21] sm:$0x1] }
 0x177   :  { %334 = vrot.lane.b32.xlu1 %v313_v26, %s3238_s0  ;;  %336 = vrot.lane.b32.xlu0 %v314_v27, %s3238_s0  ;;  %v3414_v26 = vpack.c.bf16 %v194_v21, %v192_v20  ;;  %v191_v27 = vld [vmem:[%s4228_s3 + $0x20] sm:$0xff]  ;;  %v679_v21 = vrot.slane %v662_v14, 5 }
 0x178   :  { %2909 = vmatpush1.bf16.msra.mxu1 %v3412_v25  ;;  %2925 = vmatpush1.bf16.msra.mxu0 %v3412_v25  ;;  %v959_v14 = vld [vmem:[#allocation2 + $0x2] sm:$0x1] }
 0x179   :  { %2911 = vmatprep.subr.bf16.mxu1 %v3414_v26  ;;  %2927 = vmatprep.subr.bf16.mxu0 %v3414_v26 }
 0x17b   :  { %338 = vrot.lane.b32.xlu1 %v315_v30, %s3238_s0  ;;  %v196_v30 = vld [vmem:[%s4228_s3 + $0x48] sm:$0xff] }
 0x1dc   :  { %v327_v32 = vpop.permute.xlu0 %326 }
 0x1dd   :  { %v349_v33 = vadd.f32 %v327_v32, %v269_v31  ;;  %v198_v32 = vld [vmem:[%s4228_s3 + $0x58] sm:$0xff] }
 0x1df   :  { %3100 = vtanh.f32 %v349_v33  ;;  %v706_v37 = vrot.slane %v349_v33, 7  ;;  %v3432_v33 = vpack.c.bf16 %v193_v28, %v191_v27  ;;  %v681_v28 = vrot.slane %v663_v19, 4 }
 0x1e0   :  { %v325_v35 = vpop.permute.xlu0 %324 }
 0x1e1   :  { %v348_v38 = vadd.f32 %v325_v35, %v268_v34  ;;  %v331_v39 = vpop.permute.xlu1 %330  ;;  %v3435_v34 = vpack.c.bf16 %v198_v32, %v196_v30  ;;  %v195_v35 = vld [vmem:[%s4228_s3 + $0x40] sm:$0xff]  ;;  %2913 = vmatpush1.bf16.msra.mxu1 %v3432_v33  ;;  %2929 = vmatpush1.bf16.msra.mxu0 %v3432_v33  ;;  %v665_v30 = vld [vmem:[#allocation2 + $0x31] sm:$0x1] }
 0x1e2   :  { %v351_v40 = vadd.f32 %v331_v39, %v271_v36  ;;  %v197_v36 = vld [vmem:[%s4228_s3 + $0x50] sm:$0xff]  ;;  %v202_v39 = vld [vmem:[%s4228_s3 + $0x78] sm:$0xff] }
 0x1e3   :  { %3102 = vtanh.f32 %v348_v38  ;;  %v707_v41 = vsel %vm413_vm4, %v706_v37, %v348_v38  ;;  %v200_v38 = vld [vmem:[%s4228_s3 + $0x68] sm:$0xff]  ;;  %2915 = vmatprep.subr.bf16.mxu1 %v3435_v34  ;;  %2931 = vmatprep.subr.bf16.mxu0 %v3435_v34 }
 0x1e4   :  { %3104 = vtanh.f32 %v351_v40  ;;  %v710_v52 = vrot.slane %v351_v40, 5  ;;  %v3454_v40 = vpack.c.bf16 %v197_v36, %v195_v35  ;;  %v666_v35 = vld [vmem:[#allocation2 + $0x39] sm:$0x1] }
 0x1e5   :  { %v329_v44 = vpop.permute.xlu1 %328  ;;  %v333_v45 = vpop.permute.xlu0 %332 }
 0x1e6   :  { %v350_v46 = vadd.f32 %v329_v44, %v270_v42  ;;  %v352_v47 = vadd.f32 %v333_v45, %v272_v43  ;;  %v199_v42 = vld [vmem:[%s4228_s3 + $0x60] sm:$0xff]  ;;  %v201_v43 = vld [vmem:[%s4228_s3 + $0x70] sm:$0xff]  ;;  %2917 = vmatpush1.bf16.msra.mxu1 %v3454_v40  ;;  %2933 = vmatpush1.bf16.msra.mxu0 %v3454_v40  ;;  %s3240_s3 = smov 64  }
 0x1e7   :  { %v3468_v44 = vpack.c.bf16 %v201_v43, %v199_v42  ;;  %v3515_v43 = vld [vmem:[%s4229_s4] ss:$0 sm:$0xff] }
 0x1e8   :  { %3106 = vtanh.f32 %v350_v46  ;;  %v708_v48 = vrot.slane %v350_v46, 6  ;;  %v712_v56 = vrot.slane %v352_v47, 4 }
 0x1e9   :  { %v3101_v51 = vpop.eup %3100  ;;  %3108 = vtanh.f32 %v352_v47  ;;  %v335_v53 = vpop.permute.xlu1 %334 }
 0x1ea   :  { %v337_v54 = vpop.permute.xlu0 %336  ;;  %v709_v55 = vsel %vm416_vm5, %v708_v48, %v707_v41  ;;  %v353_v57 = vadd.f32 %v335_v53, %v273_v49  ;;  %374 = vrot.lane.b32.xlu0 %v3101_v51, %s3238_s0  ;;  %v3457_v41 = vpack.c.bf16 %v202_v39, %v200_v38  ;;  %v687_v39 = vrot.slane %v666_v35, 1 }
 0x1eb   :  { %v354_v58 = vadd.f32 %v337_v54, %v274_v50  ;;  %v711_v59 = vsel %vm419_vm6, %v710_v52, %v709_v55 }
 0x1ec   :  { %v713_v61 = vsel %vm422_vm7, %v712_v56, %v711_v59  ;;  %3110 = vtanh.f32 %v353_v57  ;;  %v714_v62 = vrot.slane %v353_v57, 3  ;;  %2919 = vmatprep.subr.bf16.mxu1 %v3457_v41  ;;  %2935 = vmatprep.subr.bf16.mxu0 %v3457_v41  ;;  %v3239_v56 = vmov 0.0  }
 0x1ed   :  { %v716_v63 = vrot.slane %v354_v58, 2  ;;  %v3103_v0 = vpop.eup %3102  ;;  %3112 = vtanh.f32 %v354_v58  ;;  %v339_v1 = vpop.permute.xlu1 %338  ;;  %2921 = vmatpush1.bf16.msra.mxu1 %v3468_v44  ;;  %2937 = vmatpush1.bf16.msra.mxu0 %v3468_v44 }
 0x1ee   :  { %v3105_v2 = vpop.eup %3104  ;;  %v715_v3 = vsel %vm425_vm8, %v714_v62, %v713_v61  ;;  %v355_v4 = vadd.f32 %v339_v1, %v275_v60  ;;  %372 = vrot.lane.b32.xlu0 %v3103_v0, %s3238_s0  ;;  %2939 = vmatprep.subr.bf16.mxu1 %v3401_v16 }
 0x1ef   :  { %378 = vrot.lane.b32.xlu1 %v3105_v2, %s3238_s0  ;;  %v717_v5 = vsel %vm428_vm9, %v716_v63, %v715_v3  ;;  %2955 = vmatprep.subr.bf16.mxu0 %v3401_v16 }
 0x1f0   :  { %3114 = vtanh.f32 %v355_v4  ;;  %v718_v7 = vrot.slane %v355_v4, 1  ;;  %506 = vmatprep.mubr.f32.mxu1 %v3239_v56  ;;  %813 = vmatprep.mubr.f32.mxu0 %v3239_v56 }
 0x1f2   :  { %v3107_v8 = vpop.eup %3106  ;;  %v3388_v9 = vsel %vm431_vm10, %v718_v7, %v717_v5 }
 0x1f3   :  { %v3109_v10 = vpop.eup %3108  ;;  %376 = vrot.lane.b32.xlu1 %v3107_v8, %s3238_s0  ;;  %v661_v8 = vld [vmem:[#allocation2 + $0x11] sm:$0x1] }
 0x1f4   :  { %380 = vrot.lane.b32.xlu0 %v3109_v10, %s3238_s0  ;;  %v677_v15 = vrot.slane %v661_v8, 6  ;;  %v960_v8 = vld [vmem:[#allocation2 + $0xa] sm:$0x1] }
 0x1f6   :  { %v3111_v22 = vpop.eup %3110 }
 0x1f7   :  { %v3113_v31 = vpop.eup %3112  ;;  %382 = vrot.lane.b32.xlu1 %v3111_v22, %s3238_s0  ;;  %v664_v22 = vld [vmem:[#allocation2 + $0x29] sm:$0x1] }
 0x1f8   :  { %384 = vrot.lane.b32.xlu0 %v3113_v31, %s3238_s0  ;;  %v683_v32 = vrot.slane %v664_v22, 3 }
 0x1fa   :  { %v3115_v37 = vpop.eup %3114 }
 0x1fb   :  { %386 = vrot.lane.b32.xlu1 %v3115_v37, %s3238_s0  ;;  %v685_v37 = vrot.slane %v665_v30, 2 }
 0x25c   :  { %v375_v45 = vpop.permute.xlu0 %374 }
 0x25d   :  { %v397_v48 = vmul.f32 %v3338_v6, %v375_v45 }
 0x25f   :  { %v412_v54 = vrot.slane %v397_v48, 7 }
 0x260   :  { %v373_v46 = vpop.permute.xlu0 %372 }
 0x261   :  { %v379_v47 = vpop.permute.xlu1 %378  ;;  %v396_v49 = vmul.f32 %v3342_v11, %v373_v46 }
 0x262   :  { %v399_v50 = vmul.f32 %v3344_v12, %v379_v47 }
 0x263   :  { %v414_v58 = vsel %vm413_vm4, %v412_v54, %v396_v49 }
 0x264   :  { %v418_v6 = vrot.slane %v399_v50, 5 }
 0x265   :  { %v377_v51 = vpop.permute.xlu1 %376 }
 0x266   :  { %v398_v52 = vmul.f32 %v3349_v17, %v377_v51  ;;  %v381_v53 = vpop.permute.xlu0 %380 }
 0x267   :  { %v400_v55 = vmul.f32 %v3352_v18, %v381_v53 }
 0x268   :  { %v415_v57 = vrot.slane %v398_v52, 6 }
 0x269   :  { %v383_v59 = vpop.permute.xlu1 %382  ;;  %v421_v12 = vrot.slane %v400_v55, 4 }
 0x26a   :  { %v417_v11 = vsel %vm416_vm5, %v415_v57, %v414_v58  ;;  %v401_v60 = vmul.f32 %v3356_v23, %v383_v59  ;;  %v385_v17 = vpop.permute.xlu0 %384 }
 0x26b   :  { %v420_v61 = vsel %vm419_vm6, %v418_v6, %v417_v11  ;;  %v402_v18 = vmul.f32 %v3360_v24, %v385_v17 }
 0x26c   :  { %v423_v62 = vsel %vm422_vm7, %v421_v12, %v420_v61  ;;  %v424_v63 = vrot.slane %v401_v60, 3 }
 0x26d   :  { %v427_v0 = vrot.slane %v402_v18, 2  ;;  %v387_v1 = vpop.permute.xlu1 %386 }
 0x26e   :  { %v403_v2 = vmul.f32 %v3366_v29, %v387_v1  ;;  %v426_v3 = vsel %vm425_vm8, %v424_v63, %v423_v62  ;;  %v660_v29 = vld [vmem:[#allocation2 + $0x9] sm:$0x1] }
 0x26f   :  { %v429_v5 = vsel %vm428_vm9, %v427_v0, %v426_v3  ;;  %v675_v10 = vrot.slane %v660_v29, 7 }
 0x270   :  { %v430_v4 = vrot.slane %v403_v2, 1 }
 0x271   :  { %v676_v20 = vsel %vm413_vm4, %v675_v10, %v659_v13  ;;  %v961_v10 = vld [vmem:[#allocation2 + $0x12] sm:$0x1]  ;;  %v975_v13 = vrot.slane %v960_v8, 7 }
 0x272   :  { %v432_v7 = vsel %vm431_vm10, %v430_v4, %v429_v5  ;;  %v678_v27 = vsel %vm416_vm5, %v677_v15, %v676_v20  ;;  %v962_v15 = vld [vmem:[#allocation2 + $0x1a] sm:$0x1]  ;;  %v977_v19 = vrot.slane %v961_v10, 6  ;;  %v963_v20 = vld [vmem:[#allocation2 + $0x22] sm:$0x1] }
 0x273   :  { %433 = vrot.lane.b32.xlu0 %v432_v7, %s3240_s3  ;;  %v680_v31 = vsel %vm419_vm6, %v679_v21, %v678_v27  ;;  %v976_v21 = vsel %vm413_vm4, %v975_v13, %v959_v14  ;;  %v979_v22 = vrot.slane %v962_v15, 5  ;;  %v964_v27 = vld [vmem:[#allocation2 + $0x2a] sm:$0x1]  ;;  %v981_v30 = vrot.slane %v963_v20, 4  ;;  %v1237_v13 = vld [vmem:[#allocation2 + $0xb] sm:$0x1] }
 0x274   :  { %v682_v36 = vsel %vm422_vm7, %v681_v28, %v680_v31  ;;  %v978_v28 = vsel %vm416_vm5, %v977_v19, %v976_v21  ;;  %v965_v31 = vld [vmem:[#allocation2 + $0x32] sm:$0x1]  ;;  %v983_v35 = vrot.slane %v964_v27, 3  ;;  %v1238_v14 = vld [vmem:[#allocation2 + $0x13] sm:$0x1]  ;;  %v1252_v15 = vrot.slane %v1237_v13, 7 }
 0x275   :  { %v684_v38 = vsel %vm425_vm8, %v683_v32, %v682_v36  ;;  %v980_v32 = vsel %vm419_vm6, %v979_v22, %v978_v28  ;;  %v966_v36 = vld [vmem:[#allocation2 + $0x3a] sm:$0x1]  ;;  %v1236_v19 = vld [vmem:[#allocation2 + $0x3] sm:$0x1]  ;;  %v1239_v20 = vld [vmem:[#allocation2 + $0x1b] sm:$0x1] }
 0x276   :  { %v686_v42 = vsel %vm428_vm9, %v685_v37, %v684_v38  ;;  %v982_v37 = vsel %vm422_vm7, %v981_v30, %v980_v32  ;;  %v985_v38 = vrot.slane %v965_v31, 2  ;;  %v1254_v21 = vrot.slane %v1238_v14, 6  ;;  %v1240_v22 = vld [vmem:[#allocation2 + $0x23] sm:$0x1]  ;;  %v1241_v30 = vld [vmem:[#allocation2 + $0x2b] sm:$0x1] }
 0x277   :  { %v688_v46 = vsel %vm431_vm10, %v687_v39, %v686_v42  ;;  %v984_v39 = vsel %vm425_vm8, %v983_v35, %v982_v37  ;;  %v987_v42 = vrot.slane %v966_v36, 1  ;;  %v1253_v27 = vsel %vm413_vm4, %v1252_v15, %v1236_v19  ;;  %v1242_v35 = vld [vmem:[#allocation2 + $0x33] sm:$0x1]  ;;  %v1514_v19 = vld [vmem:[#allocation2 + $0xc] sm:$0x1] }
 0x278   :  { %v1256_v28 = vrot.slane %v1239_v20, 5  ;;  %v1255_v31 = vsel %vm416_vm5, %v1254_v21, %v1253_v27  ;;  %v1258_v32 = vrot.slane %v1240_v22, 4  ;;  %v1260_v37 = vrot.slane %v1241_v30, 3  ;;  %v1515_v20 = vld [vmem:[#allocation2 + $0x14] sm:$0x1] }
 0x279   :  { %v1529_v21 = vrot.slane %v1514_v19, 7  ;;  %v1513_v22 = vld [vmem:[#allocation2 + $0x4] sm:$0x1]  ;;  %v1516_v27 = vld [vmem:[#allocation2 + $0x1c] sm:$0x1] }
 0x27a   :  { %v1257_v36 = vsel %vm419_vm6, %v1256_v28, %v1255_v31  ;;  %v1531_v28 = vrot.slane %v1515_v20, 6  ;;  %v1517_v30 = vld [vmem:[#allocation2 + $0x24] sm:$0x1] }
 0x27b   :  { %v1530_v31 = vsel %vm413_vm4, %v1529_v21, %v1513_v22  ;;  %v1791_v22 = vld [vmem:[#allocation2 + $0xd] sm:$0x1] }
 0x2e5   :  { %v434_v23 = vpop.permute.xlu0 %433 }
 0x2e6   :  { %v437_v24 = vsel %vm436_vm11, %v434_v23, 0.0 }
 0x2e7   :  { %2799 = vmatmul.mubr.msk.f32.vlgmr.msra.gmra.mrb[0].mxu1 %vm438_vm12, %v437_v24 }
 0x2e8   :  { %2941 = vmatpush1.bf16.msra.mxu1 %v3412_v25  ;;  %1090 = vmatprep.mubr.f32.mxu1 %v3239_v56 }
 0x2e9   :  { %2943 = vmatprep.subr.bf16.mxu1 %v3414_v26 }
 0x2ec   :  { %2945 = vmatpush1.bf16.msra.mxu1 %v3432_v33 }
 0x2ed   :  { %2947 = vmatprep.subr.bf16.mxu1 %v3435_v34 }
 0x2f0   :  { %2949 = vmatpush1.bf16.msra.mxu1 %v3454_v40 }
 0x2f1   :  { %2951 = vmatprep.subr.bf16.mxu1 %v3457_v41 }
 0x2f4   :  { %2953 = vmatpush1.bf16.msra.mxu1 %v3468_v44 }
 0x2f5   :  { %2971 = vmatprep.subr.bf16.mxu1 %v3401_v16 }
 0x3ba   :  { %v508_v45 = vpop.f32.mrb[0].mxu1 }
 0x3bb   :  { %v690_v47 = vadd.f32 %v688_v46, %v508_v45  ;;  %v510_v48 = vpop.f32.mrb[1].mxu1  ;;  %v986_v45 = vsel %vm428_vm9, %v985_v38, %v984_v39  ;;  %v1243_v38 = vld [vmem:[#allocation2 + $0x3b] sm:$0x1]  ;;  %v1259_v39 = vsel %vm422_vm7, %v1258_v32, %v1257_v36  ;;  %v1533_v32 = vrot.slane %v1516_v27, 5  ;;  %v1792_v27 = vld [vmem:[#allocation2 + $0x15] sm:$0x1] }
 0x3bc   :  { %v519_v49 = vadd.f32 %v3515_v43, %v510_v48  ;;  %v1532_v36 = vsel %vm416_vm5, %v1531_v28, %v1530_v31  ;;  %v1806_v28 = vrot.slane %v1791_v22, 7  ;;  %v1793_v31 = vld [vmem:[#allocation2 + $0x1d] sm:$0x1] }
 0x3bd   :  { %3116 = vtanh.f32 %v690_v47  ;;  %v2802_v52 = vmul.f32 -1.442695, %v690_v47  ;;  %v988_v47 = vsel %vm431_vm10, %v987_v42, %v986_v45  ;;  %v1262_v42 = vrot.slane %v1242_v35, 2  ;;  %v1518_v35 = vld [vmem:[#allocation2 + $0x2c] sm:$0x1] }
 0x3be   :  { %3118 = vtanh.f32 %v519_v49  ;;  %v2801_v53 = vmul.f32 -1.442695, %v519_v49  ;;  %v1261_v45 = vsel %vm425_vm8, %v1260_v37, %v1259_v39  ;;  %v1535_v37 = vrot.slane %v1517_v30, 4  ;;  %v1790_v30 = vld [vmem:[#allocation2 + $0x5] sm:$0x1] }
 0x3bf   :  { %3120 = vpow2.f32 %v2802_v52  ;;  %v1534_v39 = vsel %vm419_vm6, %v1533_v32, %v1532_v36  ;;  %v1808_v32 = vrot.slane %v1792_v27, 6  ;;  %v1807_v36 = vsel %vm413_vm4, %v1806_v28, %v1790_v30 }
 0x3c0   :  { %3122 = vpow2.f32 %v2801_v53 }
 0x3c7   :  { %v3117_v50 = vpop.eup %3116 }
 0x3c8   :  { %v3119_v51 = vpop.eup %3118  ;;  %723 = vrot.lane.b32.xlu0 %v3117_v50, %s3238_s0 }
 0x3c9   :  { %529 = vrot.lane.b32.xlu1 %v3119_v51, %s3238_s0  ;;  %v3121_v54 = vpop.eup %3120 }
 0x3ca   :  { %v3123_v55 = vpop.eup %3122  ;;  %v694_v57 = vadd.f32 1.0, %v3121_v54 }
 0x3cb   :  { %v523_v58 = vadd.f32 1.0, %v3123_v55 }
 0x3cc   :  { %3124 = vrcp.f32 %v694_v57 }
 0x3cd   :  { %3126 = vrcp.f32 %v523_v58 }
 0x3d6   :  { %v3125_v6 = vpop.eup %3124 }
 0x3d7   :  { %v3127_v11 = vpop.eup %3126  ;;  %v721_v61 = vmul.f32 %v3125_v6, %v3388_v9 }
 0x3d8   :  { %v527_v62 = vmul.f32 0.0, %v3127_v11 }
 0x43a   :  { %v724_v59 = vpop.permute.xlu0 %723 }
 0x43b   :  { %v726_v12 = vmul.f32 %v3125_v6, %v724_v59  ;;  %v530_v60 = vpop.permute.xlu1 %529 }
 0x43c   :  { %v532_v17 = vmul.f32 %v3127_v11, %v530_v60 }
 0x43d   :  { %728 = vrot.lane.b32.xlu0 %v726_v12, %s3238_s0 }
 0x43e   :  { %534 = vrot.lane.b32.xlu1 %v532_v17, %s3238_s0 }
 0x4af   :  { %v729_v18 = vpop.permute.xlu0 %728 }
 0x4b0   :  { %v3524_v63 = vadd.f32 %v729_v18, %v721_v61  ;;  %v535_v0 = vpop.permute.xlu1 %534 }
 0x4b1   :  { %v3526_v1 = vadd.f32 %v535_v0, %v527_v62 }
 0x4b2   :  { %3128 = vtanh.f32 %v3524_v63 }
 0x4b3   :  { %3130 = vtanh.f32 %v3526_v1 }
 0x4bc   :  { %v3129_v2 = vpop.eup %3128 }
 0x4bd   :  { %v3131_v3 = vpop.eup %3130  ;;  %734 = vrot.lane.b32.xlu0 %v3129_v2, %s3238_s0 }
 0x4be   :  { %540 = vrot.lane.b32.xlu1 %v3131_v3, %s3238_s0 }
 0x52f   :  { %v735_v4 = vpop.permute.xlu0 %734 }
 0x530   :  { %v737_v5 = vmul.f32 %v3125_v6, %v735_v4  ;;  %v541_v9 = vpop.permute.xlu1 %540 }
 0x531   :  { %v3532_v7 = vmul.f32 %v3127_v11, %v541_v9 }
 0x532   :  { %739 = vrot.lane.b32.xlu1 %v737_v5, %s3240_s3 }
 0x533   :  { %742 = vrot.lane.b32.xlu0 %v3532_v7, %s3241_s11 }
 0x5a4   :  { %v740_v23 = vpop.permute.xlu1 %739 }
 0x5a5   :  { %v743_v24 = vpop.permute.xlu0 %742 }
 0x5a6   :  { %v745_v29 = vsel %vm436_vm11, %v740_v23, %v743_v24 }
 0x5a7   :  { %2803 = vmatmul.mubr.msk.f32.vlgmr.msra.gmra.mrb[8].mxu0 %vm438_vm12, %v745_v29 }
 0x5a8   :  { %2957 = vmatpush1.bf16.msra.mxu0 %v3412_v25  ;;  %1367 = vmatprep.mubr.f32.mxu0 %v3239_v56 }
 0x5a9   :  { %2959 = vmatprep.subr.bf16.mxu0 %v3414_v26 }
 0x5ac   :  { %2961 = vmatpush1.bf16.msra.mxu0 %v3432_v33 }
 0x5ad   :  { %2963 = vmatprep.subr.bf16.mxu0 %v3435_v34 }
 0x5b0   :  { %2965 = vmatpush1.bf16.msra.mxu0 %v3454_v40 }
 0x5b1   :  { %2967 = vmatprep.subr.bf16.mxu0 %v3457_v41 }
 0x5b4   :  { %2969 = vmatpush1.bf16.msra.mxu0 %v3468_v44 }
 0x5b5   :  { %2987 = vmatprep.subr.bf16.mxu0 %v3401_v16 }
 0x67a   :  { %v815_v46 = vpop.f32.mrb[8].mxu0 }
 0x67b   :  { %v990_v48 = vadd.f32 %v988_v47, %v815_v46  ;;  %v817_v49 = vpop.f32.mrb[9].mxu0  ;;  %v1264_v46 = vrot.slane %v1243_v38, 1  ;;  %v1263_v47 = vsel %vm428_vm9, %v1262_v42, %v1261_v45  ;;  %v1519_v38 = vld [vmem:[#allocation2 + $0x34] sm:$0x1]  ;;  %v1537_v42 = vrot.slane %v1518_v35, 3 }
 0x67c   :  { %v820_v50 = vadd.f32 %v3515_v43, %v817_v49  ;;  %v1520_v45 = vld [vmem:[#allocation2 + $0x3c] sm:$0x1]  ;;  %v1794_v35 = vld [vmem:[#allocation2 + $0x25] sm:$0x1] }
 0x67d   :  { %3132 = vtanh.f32 %v990_v48  ;;  %v2805_v53 = vmul.f32 -1.442695, %v990_v48  ;;  %v1265_v49 = vsel %vm431_vm10, %v1264_v46, %v1263_v47  ;;  %v1539_v46 = vrot.slane %v1519_v38, 2  ;;  %v1795_v38 = vld [vmem:[#allocation2 + $0x2d] sm:$0x1] }
 0x67e   :  { %3134 = vtanh.f32 %v820_v50  ;;  %v2804_v54 = vmul.f32 -1.442695, %v820_v50 }
 0x67f   :  { %3136 = vpow2.f32 %v2805_v53 }
 0x680   :  { %3138 = vpow2.f32 %v2804_v54 }
 0x687   :  { %v3133_v51 = vpop.eup %3132 }
 0x688   :  { %v3135_v52 = vpop.eup %3134  ;;  %1000 = vrot.lane.b32.xlu0 %v3133_v51, %s3238_s0 }
 0x689   :  { %830 = vrot.lane.b32.xlu1 %v3135_v52, %s3238_s0  ;;  %v3137_v55 = vpop.eup %3136 }
 0x68a   :  { %v3139_v57 = vpop.eup %3138  ;;  %v994_v58 = vadd.f32 1.0, %v3137_v55 }
 0x68b   :  { %v824_v6 = vadd.f32 1.0, %v3139_v57 }
 0x68c   :  { %3140 = vrcp.f32 %v994_v58 }
 0x68d   :  { %3142 = vrcp.f32 %v824_v6 }
 0x696   :  { %v3141_v59 = vpop.eup %3140 }
 0x697   :  { %v3143_v12 = vpop.eup %3142  ;;  %v998_v18 = vmul.f32 %v3141_v59, %v3524_v63 }
 0x698   :  { %v828_v0 = vmul.f32 %v3143_v12, %v3526_v1 }
 0x6fa   :  { %v1001_v11 = vpop.permute.xlu0 %1000 }
 0x6fb   :  { %v1003_v60 = vmul.f32 %v3141_v59, %v1001_v11  ;;  %v831_v17 = vpop.permute.xlu1 %830 }
 0x6fc   :  { %v833_v61 = vmul.f32 %v3143_v12, %v831_v17 }
 0x6fd   :  { %1005 = vrot.lane.b32.xlu0 %v1003_v60, %s3238_s0 }
 0x6fe   :  { %835 = vrot.lane.b32.xlu1 %v833_v61, %s3238_s0 }
 0x76f   :  { %v1006_v62 = vpop.permute.xlu0 %1005 }
 0x770   :  { %v3562_v2 = vadd.f32 %v1006_v62, %v998_v18  ;;  %v836_v3 = vpop.permute.xlu1 %835 }
 0x771   :  { %v3564_v4 = vadd.f32 %v836_v3, %v828_v0 }
 0x772   :  { %3144 = vtanh.f32 %v3562_v2 }
 0x773   :  { %3146 = vtanh.f32 %v3564_v4 }
 0x77c   :  { %v3145_v5 = vpop.eup %3144 }
 0x77d   :  { %v3147_v9 = vpop.eup %3146  ;;  %1011 = vrot.lane.b32.xlu0 %v3145_v5, %s3238_s0 }
 0x77e   :  { %841 = vrot.lane.b32.xlu1 %v3147_v9, %s3238_s0 }
 0x7ef   :  { %v1012_v23 = vpop.permute.xlu0 %1011 }
 0x7f0   :  { %v1014_v63 = vmul.f32 %v3141_v59, %v1012_v23  ;;  %v842_v24 = vpop.permute.xlu1 %841 }
 0x7f1   :  { %v3570_v29 = vmul.f32 %v3143_v12, %v842_v24 }
 0x7f2   :  { %1016 = vrot.lane.b32.xlu1 %v1014_v63, %s3240_s3 }
 0x7f3   :  { %1019 = vrot.lane.b32.xlu0 %v3570_v29, %s3241_s11 }
 0x864   :  { %v1017_v1 = vpop.permute.xlu1 %1016 }
 0x865   :  { %v1020_v8 = vpop.permute.xlu0 %1019 }
 0x866   :  { %v1022_v10 = vsel %vm436_vm11, %v1017_v1, %v1020_v8 }
 0x867   :  { %2806 = vmatmul.mubr.msk.f32.vlgmr.msra.gmra.mrb[2].mxu1 %vm438_vm12, %v1022_v10 }
 0x868   :  { %2973 = vmatpush1.bf16.msra.mxu1 %v3412_v25  ;;  %1644 = vmatprep.mubr.f32.mxu1 %v3239_v56 }
 0x869   :  { %2975 = vmatprep.subr.bf16.mxu1 %v3414_v26 }
 0x86c   :  { %2977 = vmatpush1.bf16.msra.mxu1 %v3432_v33 }
 0x86d   :  { %2979 = vmatprep.subr.bf16.mxu1 %v3435_v34 }
 0x870   :  { %2981 = vmatpush1.bf16.msra.mxu1 %v3454_v40 }
 0x871   :  { %2983 = vmatprep.subr.bf16.mxu1 %v3457_v41 }
 0x874   :  { %2985 = vmatpush1.bf16.msra.mxu1 %v3468_v44 }
 0x875   :  { %3003 = vmatprep.subr.bf16.mxu1 %v3401_v16 }
 0x93a   :  { %v1092_v48 = vpop.f32.mrb[2].mxu1 }
 0x93b   :  { %v1267_v50 = vadd.f32 %v1265_v49, %v1092_v48  ;;  %v1094_v51 = vpop.f32.mrb[3].mxu1  ;;  %v1541_v48 = vrot.slane %v1520_v45, 1  ;;  %v1796_v45 = vld [vmem:[#allocation2 + $0x35] sm:$0x1] }
 0x93c   :  { %v1097_v52 = vadd.f32 %v3515_v43, %v1094_v51 }
 0x93d   :  { %3148 = vtanh.f32 %v1267_v50  ;;  %v2808_v55 = vmul.f32 -1.442695, %v1267_v50 }
 0x93e   :  { %3150 = vtanh.f32 %v1097_v52  ;;  %v2807_v57 = vmul.f32 -1.442695, %v1097_v52 }
 0x93f   :  { %3152 = vpow2.f32 %v2808_v55 }
 0x940   :  { %3154 = vpow2.f32 %v2807_v57 }
 0x947   :  { %v3149_v53 = vpop.eup %3148 }
 0x948   :  { %v3151_v54 = vpop.eup %3150  ;;  %1277 = vrot.lane.b32.xlu0 %v3149_v53, %s3238_s0 }
 0x949   :  { %1107 = vrot.lane.b32.xlu1 %v3151_v54, %s3238_s0  ;;  %v3153_v58 = vpop.eup %3152 }
 0x94a   :  { %v3155_v6 = vpop.eup %3154  ;;  %v1271_v59 = vadd.f32 1.0, %v3153_v58 }
 0x94b   :  { %v1101_v11 = vadd.f32 1.0, %v3155_v6 }
 0x94c   :  { %3156 = vrcp.f32 %v1271_v59 }
 0x94d   :  { %3158 = vrcp.f32 %v1101_v11 }
 0x956   :  { %v3157_v12 = vpop.eup %3156 }
 0x957   :  { %v3159_v17 = vpop.eup %3158  ;;  %v1275_v0 = vmul.f32 %v3157_v12, %v3562_v2 }
 0x958   :  { %v1105_v5 = vmul.f32 %v3159_v17, %v3564_v4 }
 0x9ba   :  { %v1278_v60 = vpop.permute.xlu0 %1277 }
 0x9bb   :  { %v1280_v61 = vmul.f32 %v3157_v12, %v1278_v60  ;;  %v1108_v18 = vpop.permute.xlu1 %1107 }
 0x9bc   :  { %v1110_v62 = vmul.f32 %v3159_v17, %v1108_v18 }
 0x9bd   :  { %1282 = vrot.lane.b32.xlu0 %v1280_v61, %s3238_s0 }
 0x9be   :  { %1112 = vrot.lane.b32.xlu1 %v1110_v62, %s3238_s0 }
 0xa2f   :  { %v1283_v3 = vpop.permute.xlu0 %1282 }
 0xa30   :  { %v3600_v9 = vadd.f32 %v1283_v3, %v1275_v0  ;;  %v1113_v23 = vpop.permute.xlu1 %1112 }
 0xa31   :  { %v3602_v63 = vadd.f32 %v1113_v23, %v1105_v5 }
 0xa32   :  { %3160 = vtanh.f32 %v3600_v9 }
 0xa33   :  { %3162 = vtanh.f32 %v3602_v63 }
 0xa3c   :  { %v3161_v24 = vpop.eup %3160 }
 0xa3d   :  { %v3163_v1 = vpop.eup %3162  ;;  %1288 = vrot.lane.b32.xlu0 %v3161_v24, %s3238_s0 }
 0xa3e   :  { %1118 = vrot.lane.b32.xlu1 %v3163_v1, %s3238_s0 }
 0xaaf   :  { %v1289_v8 = vpop.permute.xlu0 %1288 }
 0xab0   :  { %v1291_v2 = vmul.f32 %v3157_v12, %v1289_v8  ;;  %v1119_v10 = vpop.permute.xlu1 %1118 }
 0xab1   :  { %v3608_v13 = vmul.f32 %v3159_v17, %v1119_v10 }
 0xab2   :  { %1293 = vrot.lane.b32.xlu1 %v1291_v2, %s3240_s3 }
 0xab3   :  { %1296 = vrot.lane.b32.xlu0 %v3608_v13, %s3241_s11 }
 0xb24   :  { %v1294_v4 = vpop.permute.xlu1 %1293 }
 0xb25   :  { %v1297_v14 = vpop.permute.xlu0 %1296 }
 0xb26   :  { %v1299_v15 = vsel %vm436_vm11, %v1294_v4, %v1297_v14 }
 0xb27   :  { %2809 = vmatmul.mubr.msk.f32.vlgmr.msra.gmra.mrb[10].mxu0 %vm438_vm12, %v1299_v15 }
 0xb28   :  { %2989 = vmatpush1.bf16.msra.mxu0 %v3412_v25  ;;  %1921 = vmatprep.mubr.f32.mxu0 %v3239_v56 }
 0xb29   :  { %2991 = vmatprep.subr.bf16.mxu0 %v3414_v26 }
 0xb2c   :  { %2993 = vmatpush1.bf16.msra.mxu0 %v3432_v33 }
 0xb2d   :  { %2995 = vmatprep.subr.bf16.mxu0 %v3435_v34 }
 0xb30   :  { %2997 = vmatpush1.bf16.msra.mxu0 %v3454_v40 }
 0xb31   :  { %2999 = vmatprep.subr.bf16.mxu0 %v3457_v41 }
 0xb34   :  { %3001 = vmatpush1.bf16.msra.mxu0 %v3468_v44 }
 0xb35   :  { %3019 = vmatprep.subr.bf16.mxu0 %v3401_v16  ;;  %v1536_v16 = vsel %vm422_vm7, %v1535_v37, %v1534_v39  ;;  %v1810_v37 = vrot.slane %v1793_v31, 5  ;;  %v1809_v39 = vsel %vm416_vm5, %v1808_v32, %v1807_v36  ;;  %v2068_v31 = vld [vmem:[#allocation2 + $0xe] sm:$0x1]  ;;  %v2069_v32 = vld [vmem:[#allocation2 + $0x16] sm:$0x1] }
 0xb36   :  { %v1538_v47 = vsel %vm425_vm8, %v1537_v42, %v1536_v16  ;;  %v1812_v42 = vrot.slane %v1794_v35, 4  ;;  %v2083_v35 = vrot.slane %v2068_v31, 7  ;;  %v2067_v36 = vld [vmem:[#allocation2 + $0x6] sm:$0x1]  ;;  %v2344_v31 = vld [vmem:[#allocation2 + $0x7] sm:$0x1] }
 0xb37   :  { %v1540_v49 = vsel %vm428_vm9, %v1539_v46, %v1538_v47  ;;  %v1811_v16 = vsel %vm419_vm6, %v1810_v37, %v1809_v39  ;;  %v1814_v46 = vrot.slane %v1795_v38, 3  ;;  %v1797_v47 = vld [vmem:[#allocation2 + $0x3d] sm:$0x1]  ;;  %v2070_v37 = vld [vmem:[#allocation2 + $0x1e] sm:$0x1] }
 0xb38   :  { %v1542_v51 = vsel %vm431_vm10, %v1541_v48, %v1540_v49  ;;  %v1813_v48 = vsel %vm422_vm7, %v1812_v42, %v1811_v16  ;;  %v1816_v49 = vrot.slane %v1796_v45, 2  ;;  %v2071_v38 = vld [vmem:[#allocation2 + $0x26] sm:$0x1]  ;;  %v2072_v39 = vld [vmem:[#allocation2 + $0x2e] sm:$0x1] }
 0xb39   :  { %v2073_v42 = vld [vmem:[#allocation2 + $0x36] sm:$0x1]  ;;  %v2074_v45 = vld [vmem:[#allocation2 + $0x3e] sm:$0x1] }
 0xb3a   :  { %v2093_v16 = vrot.slane %v2073_v42, 2  ;;  %v2351_v42 = vld [vmem:[#allocation2 + $0x3f] sm:$0x1] }
 0xbfa   :  { %v1369_v50 = vpop.f32.mrb[10].mxu0 }
 0xbfb   :  { %v1544_v52 = vadd.f32 %v1542_v51, %v1369_v50  ;;  %v1371_v53 = vpop.f32.mrb[11].mxu0  ;;  %v1815_v50 = vsel %vm425_vm8, %v1814_v46, %v1813_v48  ;;  %v1818_v51 = vrot.slane %v1797_v47, 1  ;;  %v2095_v47 = vrot.slane %v2074_v45, 1 }
 0xbfc   :  { %v1374_v54 = vadd.f32 %v3515_v43, %v1371_v53 }
 0xbfd   :  { %3164 = vtanh.f32 %v1544_v52  ;;  %v2811_v58 = vmul.f32 -1.442695, %v1544_v52  ;;  %v1817_v52 = vsel %vm428_vm9, %v1816_v49, %v1815_v50 }
 0xbfe   :  { %3166 = vtanh.f32 %v1374_v54  ;;  %v2810_v6 = vmul.f32 -1.442695, %v1374_v54  ;;  %v1819_v54 = vsel %vm431_vm10, %v1818_v51, %v1817_v52 }
 0xbff   :  { %3168 = vpow2.f32 %v2811_v58 }
 0xc00   :  { %3170 = vpow2.f32 %v2810_v6 }
 0xc07   :  { %v3165_v55 = vpop.eup %3164 }
 0xc08   :  { %v3167_v57 = vpop.eup %3166  ;;  %1554 = vrot.lane.b32.xlu0 %v3165_v55, %s3238_s0 }
 0xc09   :  { %1384 = vrot.lane.b32.xlu1 %v3167_v57, %s3238_s0  ;;  %v3169_v59 = vpop.eup %3168 }
 0xc0a   :  { %v3171_v11 = vpop.eup %3170  ;;  %v1548_v12 = vadd.f32 1.0, %v3169_v59 }
 0xc0b   :  { %v1378_v60 = vadd.f32 1.0, %v3171_v11 }
 0xc0c   :  { %3172 = vrcp.f32 %v1548_v12 }
 0xc0d   :  { %3174 = vrcp.f32 %v1378_v60 }
 0xc16   :  { %v3173_v17 = vpop.eup %3172 }
 0xc17   :  { %v3175_v18 = vpop.eup %3174  ;;  %v1552_v5 = vmul.f32 %v3173_v17, %v3600_v9 }
 0xc18   :  { %v1382_v24 = vmul.f32 %v3175_v18, %v3602_v63 }
 0xc7a   :  { %v1555_v61 = vpop.permute.xlu0 %1554 }
 0xc7b   :  { %v1557_v62 = vmul.f32 %v3173_v17, %v1555_v61  ;;  %v1385_v0 = vpop.permute.xlu1 %1384 }
 0xc7c   :  { %v1387_v3 = vmul.f32 %v3175_v18, %v1385_v0 }
 0xc7d   :  { %1559 = vrot.lane.b32.xlu0 %v1557_v62, %s3238_s0 }
 0xc7e   :  { %1389 = vrot.lane.b32.xlu1 %v1387_v3, %s3238_s0 }
 0xcef   :  { %v1560_v23 = vpop.permute.xlu0 %1559 }
 0xcf0   :  { %v3638_v1 = vadd.f32 %v1560_v23, %v1552_v5  ;;  %v1390_v8 = vpop.permute.xlu1 %1389 }
 0xcf1   :  { %v3640_v2 = vadd.f32 %v1390_v8, %v1382_v24 }
 0xcf2   :  { %3176 = vtanh.f32 %v3638_v1 }
 0xcf3   :  { %3178 = vtanh.f32 %v3640_v2 }
 0xcfc   :  { %v3177_v10 = vpop.eup %3176 }
 0xcfd   :  { %v3179_v4 = vpop.eup %3178  ;;  %1565 = vrot.lane.b32.xlu0 %v3177_v10, %s3238_s0 }
 0xcfe   :  { %1395 = vrot.lane.b32.xlu1 %v3179_v4, %s3238_s0 }
 0xd6f   :  { %v1566_v14 = vpop.permute.xlu0 %1565 }
 0xd70   :  { %v1568_v9 = vmul.f32 %v3173_v17, %v1566_v14  ;;  %v1396_v15 = vpop.permute.xlu1 %1395 }
 0xd71   :  { %v3646_v19 = vmul.f32 %v3175_v18, %v1396_v15 }
 0xd72   :  { %1570 = vrot.lane.b32.xlu1 %v1568_v9, %s3240_s3 }
 0xd73   :  { %1573 = vrot.lane.b32.xlu0 %v3646_v19, %s3241_s11 }
 0xde4   :  { %v1571_v63 = vpop.permute.xlu1 %1570 }
 0xde5   :  { %v1574_v20 = vpop.permute.xlu0 %1573 }
 0xde6   :  { %v1576_v21 = vsel %vm436_vm11, %v1571_v63, %v1574_v20 }
 0xde7   :  { %2812 = vmatmul.mubr.msk.f32.vlgmr.msra.gmra.mrb[4].mxu1 %vm438_vm12, %v1576_v21 }
 0xde8   :  { %3005 = vmatpush1.bf16.msra.mxu1 %v3412_v25  ;;  %2198 = vmatprep.mubr.f32.mxu1 %v3239_v56 }
 0xde9   :  { %3007 = vmatprep.subr.bf16.mxu1 %v3414_v26 }
 0xdec   :  { %3009 = vmatpush1.bf16.msra.mxu1 %v3432_v33 }
 0xded   :  { %3011 = vmatprep.subr.bf16.mxu1 %v3435_v34 }
 0xdf0   :  { %3013 = vmatpush1.bf16.msra.mxu1 %v3454_v40 }
 0xdf1   :  { %3015 = vmatprep.subr.bf16.mxu1 %v3457_v41 }
 0xdf4   :  { %3017 = vmatpush1.bf16.msra.mxu1 %v3468_v44 }
 0xeba   :  { %v1646_v53 = vpop.f32.mrb[4].mxu1 }
 0xebb   :  { %v1821_v55 = vadd.f32 %v1819_v54, %v1646_v53  ;;  %v1648_v57 = vpop.f32.mrb[5].mxu1 }
 0xebc   :  { %v1651_v58 = vadd.f32 %v3515_v43, %v1648_v57 }
 0xebd   :  { %3180 = vtanh.f32 %v1821_v55  ;;  %v2814_v11 = vmul.f32 -1.442695, %v1821_v55 }
 0xebe   :  { %3182 = vtanh.f32 %v1651_v58  ;;  %v2813_v12 = vmul.f32 -1.442695, %v1651_v58 }
 0xebf   :  { %3184 = vpow2.f32 %v2814_v11 }
 0xec0   :  { %3186 = vpow2.f32 %v2813_v12 }
 0xec7   :  { %v3181_v6 = vpop.eup %3180 }
 0xec8   :  { %v3183_v59 = vpop.eup %3182  ;;  %1831 = vrot.lane.b32.xlu0 %v3181_v6, %s3238_s0 }
 0xec9   :  { %1661 = vrot.lane.b32.xlu1 %v3183_v59, %s3238_s0  ;;  %v3185_v60 = vpop.eup %3184 }
 0xeca   :  { %v3187_v17 = vpop.eup %3186  ;;  %v1825_v61 = vadd.f32 1.0, %v3185_v60 }
 0xecb   :  { %v1655_v18 = vadd.f32 1.0, %v3187_v17 }
 0xecc   :  { %3188 = vrcp.f32 %v1825_v61 }
 0xecd   :  { %3190 = vrcp.f32 %v1655_v18 }
 0xed6   :  { %v3189_v62 = vpop.eup %3188 }
 0xed7   :  { %v3191_v3 = vpop.eup %3190  ;;  %v1829_v8 = vmul.f32 %v3189_v62, %v3638_v1 }
 0xed8   :  { %v1659_v4 = vmul.f32 %v3191_v3, %v3640_v2 }
 0xf3a   :  { %v1832_v0 = vpop.permute.xlu0 %1831 }
 0xf3b   :  { %v1834_v5 = vmul.f32 %v3189_v62, %v1832_v0  ;;  %v1662_v23 = vpop.permute.xlu1 %1661 }
 0xf3c   :  { %v1664_v24 = vmul.f32 %v3191_v3, %v1662_v23 }
 0xf3d   :  { %1836 = vrot.lane.b32.xlu0 %v1834_v5, %s3238_s0 }
 0xf3e   :  { %1666 = vrot.lane.b32.xlu1 %v1664_v24, %s3238_s0 }
 0xfaf   :  { %v1837_v10 = vpop.permute.xlu0 %1836 }
 0xfb0   :  { %v3675_v14 = vadd.f32 %v1837_v10, %v1829_v8  ;;  %v1667_v9 = vpop.permute.xlu1 %1666 }
 0xfb1   :  { %v3677_v15 = vadd.f32 %v1667_v9, %v1659_v4 }
 0xfb2   :  { %3192 = vtanh.f32 %v3675_v14 }
 0xfb3   :  { %3194 = vtanh.f32 %v3677_v15 }
 0xfbc   :  { %v3193_v63 = vpop.eup %3192 }
 0xfbd   :  { %v3195_v20 = vpop.eup %3194  ;;  %1842 = vrot.lane.b32.xlu0 %v3193_v63, %s3238_s0 }
 0xfbe   :  { %1672 = vrot.lane.b32.xlu1 %v3195_v20, %s3238_s0 }
0x102f   :  { %v1843_v21 = vpop.permute.xlu0 %1842 }
0x1030   :  { %v1845_v1 = vmul.f32 %v3189_v62, %v1843_v21  ;;  %v1673_v22 = vpop.permute.xlu1 %1672 }
0x1031   :  { %v3683_v27 = vmul.f32 %v3191_v3, %v1673_v22 }
0x1032   :  { %1847 = vrot.lane.b32.xlu1 %v1845_v1, %s3240_s3 }
0x1033   :  { %1850 = vrot.lane.b32.xlu0 %v3683_v27, %s3241_s11 }
0x10a4   :  { %v1848_v2 = vpop.permute.xlu1 %1847 }
0x10a5   :  { %v1851_v28 = vpop.permute.xlu0 %1850 }
0x10a6   :  { %v1853_v30 = vsel %vm436_vm11, %v1848_v2, %v1851_v28  ;;  %v2345_v2 = vld [vmem:[#allocation2 + $0xf] sm:$0x1]  ;;  %v2346_v28 = vld [vmem:[#allocation2 + $0x17] sm:$0x1] }
0x10a7   :  { %2815 = vmatmul.mubr.msk.f32.vlgmr.msra.gmra.mrb[12].mxu0 %vm438_vm12, %v1853_v30  ;;  %v2360_v30 = vrot.slane %v2345_v2, 7 }
0x10a8   :  { %3021 = vmatpush1.bf16.msra.mxu0 %v3412_v25  ;;  %2475 = vmatprep.mubr.f32.mxu0 %v3239_v56  ;;  %v2085_v25 = vrot.slane %v2069_v32, 6  ;;  %v2084_v56 = vsel %vm413_vm4, %v2083_v35, %v2067_v36  ;;  %v2347_v32 = vld [vmem:[#allocation2 + $0x1f] sm:$0x1]  ;;  %v2362_v35 = vrot.slane %v2346_v28, 6  ;;  %v2348_v36 = vld [vmem:[#allocation2 + $0x27] sm:$0x1] }
0x10a9   :  { %3023 = vmatprep.subr.bf16.mxu0 %v3414_v26  ;;  %v2087_v26 = vrot.slane %v2070_v37, 5  ;;  %v2361_v37 = vsel %vm413_vm4, %v2360_v30, %v2344_v31 }
0x10ac   :  { %3025 = vmatpush1.bf16.msra.mxu0 %v3432_v33  ;;  %v2086_v33 = vsel %vm416_vm5, %v2085_v25, %v2084_v56  ;;  %v2364_v25 = vrot.slane %v2347_v32, 5  ;;  %v2363_v56 = vsel %vm416_vm5, %v2362_v35, %v2361_v37  ;;  %v3236_v32 = vld [vmem:[%s4229_s4] ss:$0 sm:$0xff] }
0x10ad   :  { %3027 = vmatprep.subr.bf16.mxu0 %v3435_v34  ;;  %v2089_v34 = vrot.slane %v2071_v38, 4  ;;  %v2349_v38 = vld [vmem:[#allocation2 + $0x2f] sm:$0x1] }
0x10b0   :  { %3029 = vmatpush1.bf16.msra.mxu0 %v3454_v40  ;;  %v2088_v40 = vsel %vm419_vm6, %v2087_v26, %v2086_v33  ;;  %v2366_v26 = vrot.slane %v2348_v36, 4  ;;  %v2365_v33 = vsel %vm419_vm6, %v2364_v25, %v2363_v56 }
0x10b1   :  { %3031 = vmatprep.subr.bf16.mxu0 %v3457_v41  ;;  %v2091_v41 = vrot.slane %v2072_v39, 3  ;;  %v2350_v39 = vld [vmem:[#allocation2 + $0x37] sm:$0x1] }
0x10b4   :  { %3033 = vmatpush1.bf16.msra.mxu0 %v3468_v44  ;;  %v2090_v44 = vsel %vm422_vm7, %v2089_v34, %v2088_v40  ;;  %v2368_v34 = vrot.slane %v2349_v38, 3  ;;  %v2367_v40 = vsel %vm422_vm7, %v2366_v26, %v2365_v33 }
0x10b5   :  { %v2092_v46 = vsel %vm425_vm8, %v2091_v41, %v2090_v44  ;;  %v2370_v41 = vrot.slane %v2350_v39, 2  ;;  %v2372_v44 = vrot.slane %v2351_v42, 1 }
0x10b6   :  { %v2094_v48 = vsel %vm428_vm9, %v2093_v16, %v2092_v46  ;;  %v2369_v45 = vsel %vm425_vm8, %v2368_v34, %v2367_v40 }
0x10b7   :  { %v2096_v50 = vsel %vm431_vm10, %v2095_v47, %v2094_v48  ;;  %v2371_v16 = vsel %vm428_vm9, %v2370_v41, %v2369_v45 }
0x10b8   :  { %v2373_v47 = vsel %vm431_vm10, %v2372_v44, %v2371_v16 }
0x117a   :  { %v1923_v49 = vpop.f32.mrb[12].mxu0 }
0x117b   :  { %v2098_v51 = vadd.f32 %v2096_v50, %v1923_v49  ;;  %v1925_v52 = vpop.f32.mrb[13].mxu0 }
0x117c   :  { %v1928_v53 = vadd.f32 %v3515_v43, %v1925_v52 }
0x117d   :  { %3196 = vtanh.f32 %v2098_v51  ;;  %v2817_v57 = vmul.f32 -1.442695, %v2098_v51 }
0x117e   :  { %3198 = vtanh.f32 %v1928_v53  ;;  %v2816_v58 = vmul.f32 -1.442695, %v1928_v53 }
0x117f   :  { %3200 = vpow2.f32 %v2817_v57 }
0x1180   :  { %3202 = vpow2.f32 %v2816_v58 }
0x1187   :  { %v3197_v54 = vpop.eup %3196 }
0x1188   :  { %v3199_v55 = vpop.eup %3198  ;;  %2108 = vrot.lane.b32.xlu0 %v3197_v54, %s3238_s0 }
0x1189   :  { %1938 = vrot.lane.b32.xlu1 %v3199_v55, %s3238_s0  ;;  %v3201_v6 = vpop.eup %3200 }
0x118a   :  { %v3203_v59 = vpop.eup %3202  ;;  %v2102_v11 = vadd.f32 1.0, %v3201_v6 }
0x118b   :  { %v1932_v12 = vadd.f32 1.0, %v3203_v59 }
0x118c   :  { %3204 = vrcp.f32 %v2102_v11 }
0x118d   :  { %3206 = vrcp.f32 %v1932_v12 }
0x1196   :  { %v3205_v60 = vpop.eup %3204 }
0x1197   :  { %v3207_v61 = vpop.eup %3206  ;;  %v2106_v3 = vmul.f32 %v3205_v60, %v3675_v14 }
0x1198   :  { %v1936_v23 = vmul.f32 %v3207_v61, %v3677_v15 }
0x11fa   :  { %v2109_v17 = vpop.permute.xlu0 %2108 }
0x11fb   :  { %v2111_v18 = vmul.f32 %v3205_v60, %v2109_v17  ;;  %v1939_v62 = vpop.permute.xlu1 %1938 }
0x11fc   :  { %v1941_v0 = vmul.f32 %v3207_v61, %v1939_v62 }
0x11fd   :  { %2113 = vrot.lane.b32.xlu0 %v2111_v18, %s3238_s0 }
0x11fe   :  { %1943 = vrot.lane.b32.xlu1 %v1941_v0, %s3238_s0 }
0x126f   :  { %v2114_v5 = vpop.permute.xlu0 %2113 }
0x1270   :  { %v3712_v24 = vadd.f32 %v2114_v5, %v2106_v3  ;;  %v1944_v8 = vpop.permute.xlu1 %1943 }
0x1271   :  { %v3714_v10 = vadd.f32 %v1944_v8, %v1936_v23 }
0x1272   :  { %3208 = vtanh.f32 %v3712_v24 }
0x1273   :  { %3210 = vtanh.f32 %v3714_v10 }
0x127c   :  { %v3209_v4 = vpop.eup %3208 }
0x127d   :  { %v3211_v9 = vpop.eup %3210  ;;  %2119 = vrot.lane.b32.xlu0 %v3209_v4, %s3238_s0 }
0x127e   :  { %1949 = vrot.lane.b32.xlu1 %v3211_v9, %s3238_s0 }
0x12ef   :  { %v2120_v63 = vpop.permute.xlu0 %2119 }
0x12f0   :  { %v2122_v14 = vmul.f32 %v3205_v60, %v2120_v63  ;;  %v1950_v20 = vpop.permute.xlu1 %1949 }
0x12f1   :  { %v3720_v21 = vmul.f32 %v3207_v61, %v1950_v20 }
0x12f2   :  { %2124 = vrot.lane.b32.xlu1 %v2122_v14, %s3240_s3 }
0x12f3   :  { %2127 = vrot.lane.b32.xlu0 %v3720_v21, %s3241_s11 }
0x1364   :  { %v2125_v15 = vpop.permute.xlu1 %2124 }
0x1365   :  { %v2128_v1 = vpop.permute.xlu0 %2127 }
0x1366   :  { %v2130_v22 = vsel %vm436_vm11, %v2125_v15, %v2128_v1  ;;  %v3242_v15 = vmov 1966171168  }
0x1367   :  { %2818 = vmatmul.mubr.msk.f32.vlgmr.msra.gmra.mrb[6].mxu1 %vm438_vm12, %v2130_v22  ;;  %v547_v1 = vunpack.c.l.s4 %v3242_v15  ;;  %v549_v22 = vlaneseq }
0x1369   :  { %v548_v2 = vunpack.c.0.s8 %v547_v1  ;;  %v550_v28 = vshrl.u32 %v549_v22, 7 }
0x136b   :  { %v3756_v36 = vsub.s32 %v548_v2, %v550_v28  ;;  %v3773_v34 = vsub.s32 0, %v550_v28 }
0x136d   :  { %v853_v37 = vrot.slane %v3570_v29, %v3756_v36  ;;  %v1407_v25 = vrot.slane %v3646_v19, %v3756_v36  ;;  %v1961_v26 = vrot.slane %v3720_v21, %v3756_v36  ;;  %v552_v1 = vrot.slane %v3532_v7, %v3756_v36 }
0x136e   :  { %v1130_v22 = vrot.slane %v3608_v13, %v3756_v36 }
0x136f   :  { %v3763_v38 = vrot.slane %v853_v37, %v3756_v36  ;;  %v3766_v56 = vrot.slane %v1407_v25, %v3756_v36  ;;  %v861_v42 = vcombine.high %v853_v37, %v853_v37  ;;  %v3776_v40 = vrot.slane %v1961_v26, %v3756_v36 }
0x1370   :  { %v1415_v44 = vcombine.high %v1407_v25, %v1407_v25  ;;  %v3859_v2 = vrot.slane %v552_v1, %v3756_v36  ;;  %v3869_v37 = vrot.slane %v1130_v22, %v3756_v36 }
0x1371   :  { %v891_v39 = vcombine.high %v3763_v38, %v3763_v38  ;;  %v1445_v45 = vcombine.high %v3766_v56, %v3766_v56 }
0x1373   :  { %v906_v41 = vrot.slane %v891_v39, %v3773_v34  ;;  %v1460_v16 = vrot.slane %v1445_v45, %v3773_v34  ;;  %v560_v45 = vcombine.high %v552_v1, %v552_v1  ;;  %v1677_v1 = vcombine.high %v3683_v27, %v3683_v27 }
0x143a   :  { %v2200_v46 = vpop.f32.mrb[6].mxu1 }
0x143b   :  { %v2375_v48 = vadd.f32 %v2373_v47, %v2200_v46  ;;  %v2202_v49 = vpop.f32.mrb[7].mxu1  ;;  %v1999_v46 = vcombine.high %v3776_v40, %v3776_v40  ;;  %v3786_v47 = vrot.slane %v861_v42, %v3756_v36  ;;  %v1168_v42 = vcombine.high %v3869_v37, %v3869_v37 }
0x143c   :  { %v2205_v50 = vadd.f32 %v3515_v43, %v2202_v49 }
0x143d   :  { %3212 = vtanh.f32 %v2375_v48  ;;  %v2820_v53 = vmul.f32 -1.442695, %v2375_v48  ;;  %v1969_v48 = vcombine.high %v1961_v26, %v1961_v26  ;;  %v2014_v49 = vrot.slane %v1999_v46, %v3773_v34 }
0x143e   :  { %3214 = vtanh.f32 %v2205_v50  ;;  %v2819_v54 = vmul.f32 -1.442695, %v2205_v50  ;;  %v893_v50 = vcombine.high %v3786_v47, %v3786_v47 }
0x143f   :  { %3216 = vpow2.f32 %v2820_v53 }
0x1440   :  { %3218 = vpow2.f32 %v2819_v54  ;;  %v910_v53 = vrot.slane %v893_v50, %v3773_v34 }
0x1447   :  { %v3213_v51 = vpop.eup %3212 }
0x1448   :  { %v3215_v52 = vpop.eup %3214  ;;  %2385 = vrot.lane.b32.xlu0 %v3213_v51, %s3238_s0  ;;  %v3793_v51 = vrot.slane %v1415_v44, %v3756_v36 }
0x1449   :  { %2215 = vrot.lane.b32.xlu1 %v3215_v52, %s3238_s0  ;;  %v3217_v55 = vpop.eup %3216  ;;  %v846_v52 = vcombine.high %v3570_v29, %v3570_v29 }
0x144a   :  { %v3219_v57 = vpop.eup %3218  ;;  %v2379_v58 = vadd.f32 1.0, %v3217_v55  ;;  %v1447_v54 = vcombine.high %v3793_v51, %v3793_v51  ;;  %v3802_v55 = vrot.slane %v1969_v48, %v3756_v36 }
0x144b   :  { %v2209_v6 = vadd.f32 1.0, %v3219_v57  ;;  %v1400_v57 = vcombine.high %v3646_v19, %v3646_v19  ;;  %v860_v29 = vrot.slane %v846_v52, %v3756_v36 }
0x144c   :  { %3220 = vrcp.f32 %v2379_v58  ;;  %v1464_v58 = vrot.slane %v1447_v54, %v3773_v34 }
0x144d   :  { %3222 = vrcp.f32 %v2209_v6  ;;  %v2001_v6 = vcombine.high %v3802_v55, %v3802_v55 }
0x1456   :  { %v3221_v59 = vpop.eup %3220 }
0x1457   :  { %v3223_v11 = vpop.eup %3222  ;;  %v2383_v61 = vmul.f32 %v3221_v59, %v3712_v24 }
0x1458   :  { %v2213_v62 = vmul.f32 %v3223_v11, %v3714_v10 }
0x14ba   :  { %v2386_v43 = vpop.permute.xlu0 %2385 }
0x14bb   :  { %v2388_v12 = vmul.f32 %v3221_v59, %v2386_v43  ;;  %v2216_v60 = vpop.permute.xlu1 %2215  ;;  %v1954_v43 = vcombine.high %v3720_v21, %v3720_v21  ;;  %v862_v21 = vcombine.high %v860_v29, %v860_v29 }
0x14bc   :  { %v2218_v17 = vmul.f32 %v3223_v11, %v2216_v60 }
0x14bd   :  { %2390 = vrot.lane.b32.xlu0 %v2388_v12, %s3238_s0  ;;  %v3817_v12 = vrot.slane %v860_v29, %v3756_v36  ;;  %v1968_v19 = vrot.slane %v1954_v43, %v3756_v36 }
0x14be   :  { %2220 = vrot.lane.b32.xlu1 %v2218_v17, %s3238_s0 }
0x14bf   :  { %v914_v60 = vrot.slane %v3817_v12, %v3773_v34 }
0x152f   :  { %v2391_v18 = vpop.permute.xlu0 %2390 }
0x1530   :  { %v2393_v0 = vadd.f32 %v2391_v18, %v2383_v61  ;;  %v2221_v3 = vpop.permute.xlu1 %2220  ;;  %v3828_v61 = vrot.slane %v1968_v19, %v3756_v36 }
0x1531   :  { %v3741_v5 = vadd.f32 %v2221_v3, %v2213_v62  ;;  %v3836_v3 = vrot.slane %v862_v21, %v3756_v36 }
0x1532   :  { %3224 = vtanh.f32 %v2393_v0  ;;  %v2022_v0 = vrot.slane %v3828_v61, %v3773_v34 }
0x1533   :  { %3226 = vtanh.f32 %v3741_v5 }
0x153c   :  { %v3225_v23 = vpop.eup %3224 }
0x153d   :  { %v3227_v8 = vpop.eup %3226  ;;  %2396 = vrot.lane.b32.xlu0 %v3225_v23, %s3238_s0  ;;  %v1970_v23 = vcombine.high %v1968_v19, %v1968_v19 }
0x153e   :  { %2226 = vrot.lane.b32.xlu1 %v3227_v8, %s3238_s0  ;;  %v918_v8 = vrot.slane %v3836_v3, %v3773_v34 }
0x15af   :  { %v2397_v4 = vpop.permute.xlu0 %2396 }
0x15b0   :  { %v2399_v9 = vmul.f32 %v3221_v59, %v2397_v4  ;;  %v2227_v63 = vpop.permute.xlu1 %2226  ;;  %v1414_v59 = vrot.slane %v1400_v57, %v3756_v36 }
0x15b1   :  { %v3746_v24 = vmul.f32 %v3223_v11, %v2227_v63  ;;  %v2018_v11 = vrot.slane %v2001_v6, %v3773_v34  ;;  %v3848_v63 = vrot.slane %v1970_v23, %v3756_v36 }
0x15b2   :  { %2401 = vrot.lane.b32.xlu1 %v2399_v9, %s3240_s3  ;;  %v3824_v17 = vrot.slane %v1414_v59, %v3756_v36  ;;  %v1416_v62 = vcombine.high %v1414_v59, %v1414_v59 }
0x15b3   :  { %2404 = vrot.lane.b32.xlu0 %v3746_v24, %s3241_s11  ;;  %v2238_v39 = vrot.slane %v3746_v24, %v3756_v36 }
0x15b4   :  { %v1468_v18 = vrot.slane %v3824_v17, %v3773_v34  ;;  %v3842_v4 = vrot.slane %v1416_v62, %v3756_v36 }
0x15b5   :  { %v3883_v44 = vrot.slane %v2238_v39, %v3756_v36  ;;  %v2246_v43 = vcombine.high %v2238_v39, %v2238_v39 }
0x15b6   :  { %v1472_v9 = vrot.slane %v3842_v4, %v3773_v34 }
0x15b7   :  { %v2276_v52 = vcombine.high %v3883_v44, %v3883_v44  ;;  %v3917_v62 = vrot.slane %v2246_v43, %v3756_v36 }
0x1624   :  { %v2402_v10 = vpop.permute.xlu1 %2401 }
0x1625   :  { %v2405_v14 = vpop.permute.xlu0 %2404 }
0x1626   :  { %v2407_v20 = vsel %vm436_vm11, %v2402_v10, %v2405_v14  ;;  %v2026_v10 = vrot.slane %v3848_v63, %v3773_v34 }
0x1627   :  { %2821 = vmatmul.mubr.msk.f32.vlgmr.msra.gmra.mrb[14].mxu0 %vm438_vm12, %v2407_v20 }
0x16fa   :  { %v2477_v30 = vpop.f32.mrb[14].mxu0 }
0x16fb   :  { %v2478_v31 = vpop.f32.mrb[15].mxu0 }
0x16fc   :  { %v2481_v35 = vadd.f32 %v3236_v32, %v2478_v31  ;;  %v1684_v31 = vrot.slane %v3683_v27, %v3756_v36 }
0x16fe   :  { %3228 = vtanh.f32 %v2481_v35  ;;  %v2822_v14 = vmul.f32 -1.442695, %v2481_v35  ;;  %v590_v35 = vcombine.high %v3859_v2, %v3859_v2  ;;  %v3873_v26 = vrot.slane %v1684_v31, %v3756_v36 }
0x16ff   :  { %v1692_v57 = vcombine.high %v1684_v31, %v1684_v31  ;;  %v1691_v31 = vrot.slane %v1677_v1, %v3756_v36 }
0x1700   :  { %3230 = vpow2.f32 %v2822_v14  ;;  %v1722_v46 = vcombine.high %v3873_v26, %v3873_v26  ;;  %v2278_v14 = vcombine.high %v3917_v62, %v3917_v62 }
0x1701   :  { %v3952_v39 = vrot.slane %v1691_v31, %v3756_v36 }
0x1702   :  { %v1737_v50 = vrot.slane %v1722_v46, %v3773_v34 }
0x1708   :  { %v3229_v33 = vpop.eup %3228 }
0x1709   :  { %2491 = vrot.lane.b32.xlu1 %v3229_v33, %s3238_s0  ;;  %v605_v33 = vrot.slane %v590_v35, %v3773_v34 }
0x170a   :  { %v3231_v20 = vpop.eup %3230 }
0x170b   :  { %v2485_v15 = vadd.f32 1.0, %v3231_v20 }
0x170d   :  { %931 = vrot.lane.b32.xlu1 %v906_v41, %s3240_s3  ;;  %3232 = vrcp.f32 %v2485_v15 }
0x1711   :  { %1485 = vrot.lane.b32.xlu1 %v1460_v16, %s3240_s3  ;;  %v1183_v16 = vrot.slane %v1168_v42, %v3773_v34 }
0x1715   :  { %2039 = vrot.lane.b32.xlu1 %v2014_v49, %s3240_s3  ;;  %v1138_v49 = vcombine.high %v1130_v22, %v1130_v22  ;;  %v2295_v22 = vrot.slane %v2278_v14, %v3773_v34  ;;  %v892_v14 = vcombine.high %v3817_v12, %v3817_v12  ;;  %v1446_v12 = vcombine.high %v3824_v17, %v3824_v17 }
0x1717   :  { %v3861_v28 = vpop.eup %3232  ;;  %v3903_v29 = vrot.slane %v1138_v49, %v3756_v36  ;;  %v922_v1 = vrot.slane %v892_v14, %v3773_v34 }
0x1719   :  { %933 = vrot.lane.b32.xlu1 %v910_v53, %s3240_s3  ;;  %v3895_v53 = vrot.slane %v560_v45, %v3756_v36  ;;  %v1170_v19 = vcombine.high %v3903_v29, %v3903_v29 }
0x171b   :  { %v592_v6 = vcombine.high %v3895_v53, %v3895_v53 }
0x171d   :  { %1487 = vrot.lane.b32.xlu1 %v1464_v58, %s3240_s3  ;;  %v2291_v58 = vrot.slane %v2276_v52, %v3773_v34  ;;  %v1693_v52 = vcombine.high %v1691_v31, %v1691_v31 }
0x1721   :  { %2041 = vrot.lane.b32.xlu1 %v2018_v11, %s3240_s3  ;;  %v609_v11 = vrot.slane %v592_v6, %v3773_v34 }
0x1725   :  { %935 = vrot.lane.b32.xlu1 %v914_v60, %s3240_s3  ;;  %v3911_v60 = vrot.slane %v1692_v57, %v3756_v36 }
0x1727   :  { %v1724_v23 = vcombine.high %v3911_v60, %v3911_v60 }
0x1729   :  { %1489 = vrot.lane.b32.xlu1 %v1468_v18, %s3240_s3  ;;  %v545_v18 = vcombine.high %v3532_v7, %v3532_v7  ;;  %v1741_v7 = vrot.slane %v1724_v23, %v3773_v34  ;;  %v1452_v23 = vrot.slane %v3766_v56, %v3773_v34  ;;  %v601_v56 = vrot.slane %v3895_v53, %v3773_v34 }
0x172a   :  { %v1733_v53 = vrot.slane %v3911_v60, %v3773_v34 }
0x172d   :  { %2043 = vrot.lane.b32.xlu1 %v2022_v0, %s3240_s3  ;;  %v1187_v0 = vrot.slane %v1170_v19, %v3773_v34 }
0x1731   :  { %937 = vrot.lane.b32.xlu1 %v918_v8, %s3240_s3 }
0x1735   :  { %1491 = vrot.lane.b32.xlu1 %v1472_v9, %s3240_s3  ;;  %v559_v9 = vrot.slane %v545_v18, %v3756_v36  ;;  %v898_v18 = vrot.slane %v3763_v38, %v3773_v34  ;;  %v2006_v38 = vrot.slane %v3776_v40, %v3773_v34  ;;  %v1179_v40 = vrot.slane %v3903_v29, %v3773_v34 }
0x1739   :  { %2045 = vrot.lane.b32.xlu1 %v2026_v10, %s3240_s3  ;;  %v1123_v10 = vcombine.high %v3608_v13, %v3608_v13  ;;  %v3938_v13 = vrot.slane %v559_v9, %v3756_v36 }
0x173b   :  { %v1137_v15 = vrot.slane %v1123_v10, %v3756_v36  ;;  %v613_v27 = vrot.slane %v3938_v13, %v3773_v34 }
0x173d   :  { %v3948_v35 = vrot.slane %v1137_v15, %v3756_v36 }
0x177b   :  { %v2492_v30 = vpop.permute.xlu1 %2491 }
0x177c   :  { %v2494_v32 = vmul.f32 %v3861_v28, %v2492_v30 }
0x177e   :  { %2496 = vrot.lane.b32.xlu0 %v2494_v32, %s3238_s0  ;;  %v2231_v32 = vcombine.high %v3746_v24, %v3746_v24  ;;  %v1191_v24 = vrot.slane %v3948_v35, %v3773_v34 }
0x177f   :  { %v932_v25 = vpop.permute.xlu1 %931 }
0x1780   :  { %953 = vst.msk [vmem:[#allocation3 + $0x11] sm:$0x1] %vm650_vm13, %v932_v25 }
0x1782   :  { %630 = vrot.lane.b32.xlu0 %v605_v33, %s3240_s3  ;;  %v2245_v33 = vrot.slane %v2231_v32, %v3756_v36  ;;  %v1476_v32 = vrot.slane %v1446_v12, %v3773_v34 }
0x1783   :  { %v1486_v41 = vpop.permute.xlu1 %1485 }
0x1784   :  { %1507 = vst.msk [vmem:[#allocation3 + $0x13] sm:$0x1] %vm650_vm13, %v1486_v41  ;;  %v561_v41 = vcombine.high %v559_v9, %v559_v9  ;;  %v3960_v45 = vrot.slane %v2245_v33, %v3756_v36  ;;  %v2010_v9 = vrot.slane %v3802_v55, %v3773_v34 }
0x1786   :  { %1208 = vrot.lane.b32.xlu0 %v1183_v16, %s3240_s3  ;;  %v1745_v16 = vrot.slane %v3952_v39, %v3773_v34  ;;  %v2299_v49 = vrot.slane %v3960_v45, %v3773_v34 }
0x1787   :  { %v2040_v48 = vpop.permute.xlu1 %2039 }
0x1788   :  { %2061 = vst.msk [vmem:[#allocation3 + $0x15] sm:$0x1] %vm650_vm13, %v2040_v48  ;;  %v1139_v48 = vcombine.high %v1137_v15, %v1137_v15 }
0x178a   :  { %1762 = vrot.lane.b32.xlu0 %v1737_v50, %s3240_s3  ;;  %v3970_v50 = vrot.slane %v561_v41, %v3756_v36  ;;  %v3976_v57 = vrot.slane %v1139_v48, %v3756_v36 }
0x178b   :  { %v934_v54 = vpop.permute.xlu1 %933 }
0x178c   :  { %954 = vst.msk [vmem:[#allocation3 + $0x19] sm:$0x1] %vm650_vm13, %v934_v54  ;;  %v617_v54 = vrot.slane %v3970_v50, %v3773_v34  ;;  %v1195_v6 = vrot.slane %v3976_v57, %v3773_v34 }
0x178e   :  { %2316 = vrot.lane.b32.xlu0 %v2291_v58, %s3240_s3  ;;  %v2247_v58 = vcombine.high %v2245_v33, %v2245_v33 }
0x178f   :  { %v1488_v59 = vpop.permute.xlu1 %1487 }
0x1790   :  { %1508 = vst.msk [vmem:[#allocation3 + $0x1b] sm:$0x1] %vm650_vm13, %v1488_v59  ;;  %v3982_v59 = vrot.slane %v1693_v52, %v3756_v36 }
0x1792   :  { %632 = vrot.lane.b32.xlu0 %v609_v11, %s3240_s3  ;;  %v1749_v43 = vrot.slane %v3982_v59, %v3773_v34  ;;  %v3988_v11 = vrot.slane %v2247_v58, %v3756_v36 }
0x1793   :  { %v2042_v21 = vpop.permute.xlu1 %2041 }
0x1794   :  { %2062 = vst.msk [vmem:[#allocation3 + $0x1d] sm:$0x1] %vm650_vm13, %v2042_v21  ;;  %v2303_v19 = vrot.slane %v3988_v11, %v3773_v34  ;;  %v597_v21 = vrot.slane %v3859_v2, %v3773_v34  ;;  %v1729_v2 = vrot.slane %v3873_v26, %v3773_v34  ;;  %v902_v26 = vrot.slane %v3786_v47, %v3773_v34 }
0x1795   :  { %v2489_v47 = vmul.f32 %v3861_v28, %v3741_v5 }
0x1796   :  { %1210 = vrot.lane.b32.xlu0 %v1187_v0, %s3240_s3  ;;  %v1175_v0 = vrot.slane %v3869_v37, %v3773_v34  ;;  %v2283_v37 = vrot.slane %v3883_v44, %v3773_v34  ;;  %v1456_v44 = vrot.slane %v3793_v51, %v3773_v34  ;;  %v2287_v51 = vrot.slane %v3917_v62, %v3773_v34 }
0x1797   :  { %v936_v8 = vpop.permute.xlu1 %935 }
0x1798   :  { %955 = vst.msk [vmem:[#allocation3 + $0x21] sm:$0x1] %vm650_vm13, %v936_v8 }
0x179a   :  { %1764 = vrot.lane.b32.xlu0 %v1741_v7, %s3240_s3  ;;  %v591_v7 = vcombine.high %v3938_v13, %v3938_v13 }
0x179b   :  { %v1490_v20 = vpop.permute.xlu1 %1489 }
0x179c   :  { %1509 = vst.msk [vmem:[#allocation3 + $0x23] sm:$0x1] %vm650_vm13, %v1490_v20  ;;  %v621_v20 = vrot.slane %v591_v7, %v3773_v34 }
0x179e   :  { %2318 = vrot.lane.b32.xlu0 %v2295_v22, %s3240_s3  ;;  %v1169_v22 = vcombine.high %v3948_v35, %v3948_v35 }
0x179f   :  { %v2044_v30 = vpop.permute.xlu1 %2043 }
0x17a0   :  { %2063 = vst.msk [vmem:[#allocation3 + $0x25] sm:$0x1] %vm650_vm13, %v2044_v30  ;;  %v1199_v30 = vrot.slane %v1169_v22, %v3773_v34 }
0x17a2   :  { %634 = vrot.lane.b32.xlu0 %v613_v27, %s3240_s3  ;;  %v1723_v27 = vcombine.high %v3952_v39, %v3952_v39  ;;  %v2277_v39 = vcombine.high %v3960_v45, %v3960_v45  ;;  %v894_v45 = vcombine.high %v3836_v3, %v3836_v3  ;;  %v1448_v3 = vcombine.high %v3842_v4, %v3842_v4 }
0x17a3   :  { %v938_v25 = vpop.permute.xlu1 %937  ;;  %v2002_v4 = vcombine.high %v3848_v63, %v3848_v63 }
0x17a4   :  { %956 = vst.msk [vmem:[#allocation3 + $0x29] sm:$0x1] %vm650_vm13, %v938_v25  ;;  %v1753_v17 = vrot.slane %v1723_v27, %v3773_v34  ;;  %v2000_v25 = vcombine.high %v3828_v61, %v3828_v61  ;;  %v2307_v41 = vrot.slane %v2277_v39, %v3773_v34  ;;  %v593_v61 = vcombine.high %v3970_v50, %v3970_v50 }
0x17a5   :  { %v1171_v50 = vcombine.high %v3976_v57, %v3976_v57  ;;  %v1725_v57 = vcombine.high %v3982_v59, %v3982_v59  ;;  %v2279_v59 = vcombine.high %v3988_v11, %v3988_v11 }
0x17a6   :  { %1212 = vrot.lane.b32.xlu0 %v1191_v24, %s3240_s3  ;;  %v2030_v24 = vrot.slane %v2000_v25, %v3773_v34 }
0x17a7   :  { %v1492_v42 = vpop.permute.xlu1 %1491 }
0x17a8   :  { %1510 = vst.msk [vmem:[#allocation3 + $0x2b] sm:$0x1] %vm650_vm13, %v1492_v42 }
0x17aa   :  { %1766 = vrot.lane.b32.xlu0 %v1745_v16, %s3240_s3 }
0x17ab   :  { %v2046_v46 = vpop.permute.xlu1 %2045 }
0x17ac   :  { %2064 = vst.msk [vmem:[#allocation3 + $0x2d] sm:$0x1] %vm650_vm13, %v2046_v46  ;;  %v625_v46 = vrot.slane %v593_v61, %v3773_v34 }
0x17ae   :  { %2320 = vrot.lane.b32.xlu0 %v2299_v49, %s3240_s3  ;;  %v926_v49 = vrot.slane %v894_v45, %v3773_v34 }
0x17b2   :  { %636 = vrot.lane.b32.xlu0 %v617_v54, %s3240_s3  ;;  %v1203_v54 = vrot.slane %v1171_v50, %v3773_v34 }
0x17b6   :  { %1214 = vrot.lane.b32.xlu0 %v1195_v6, %s3240_s3  ;;  %v1480_v6 = vrot.slane %v1448_v3, %v3773_v34 }
0x17ba   :  { %1768 = vrot.lane.b32.xlu0 %v1749_v43, %s3240_s3 }
0x17be   :  { %2322 = vrot.lane.b32.xlu0 %v2303_v19, %s3240_s3  ;;  %v1757_v19 = vrot.slane %v1725_v57, %v3773_v34 }
0x17c2   :  { %626 = vrot.lane.b32.xlu0 %v597_v21, %s3240_s3 }
0x17c6   :  { %927 = vrot.lane.b32.xlu0 %v898_v18, %s3240_s3  ;;  %v2034_v18 = vrot.slane %v2002_v4, %v3773_v34 }
0x17ca   :  { %1204 = vrot.lane.b32.xlu0 %v1175_v0, %s3240_s3 }
0x17ce   :  { %1481 = vrot.lane.b32.xlu0 %v1452_v23, %s3240_s3  ;;  %v2311_v23 = vrot.slane %v2279_v59, %v3773_v34 }
0x17d2   :  { %1758 = vrot.lane.b32.xlu0 %v1729_v2, %s3240_s3 }
0x17d6   :  { %2035 = vrot.lane.b32.xlu0 %v2006_v38, %s3240_s3 }
0x17da   :  { %2312 = vrot.lane.b32.xlu0 %v2283_v37, %s3240_s3 }
0x17de   :  { %628 = vrot.lane.b32.xlu0 %v601_v56, %s3240_s3 }
0x17e2   :  { %929 = vrot.lane.b32.xlu0 %v902_v26, %s3240_s3 }
0x17e6   :  { %1206 = vrot.lane.b32.xlu0 %v1179_v40, %s3240_s3 }
0x17ea   :  { %1483 = vrot.lane.b32.xlu0 %v1456_v44, %s3240_s3 }
0x17ee   :  { %1760 = vrot.lane.b32.xlu0 %v1733_v53, %s3240_s3 }
0x17f0   :  { %v2497_v8 = vpop.permute.xlu0 %2496 }
0x17f1   :  { %v2499_v29 = vadd.f32 %v2497_v8, %v2489_v47 }
0x17f2   :  { %2037 = vrot.lane.b32.xlu0 %v2010_v9, %s3240_s3 }
0x17f3   :  { %3234 = vtanh.f32 %v2499_v29 }
0x17f4   :  { %v631_v10 = vpop.permute.xlu0 %630 }
0x17f5   :  { %653 = vst.msk [vmem:[#allocation3 + $0x10] sm:$0x1] %vm650_vm13, %v631_v10 }
0x17f6   :  { %2314 = vrot.lane.b32.xlu0 %v2287_v51, %s3240_s3  ;;  %v2628_v51 = vld [vmem:[%s4230_s5] sm:$0xff] }
0x17f8   :  { %v1209_v60 = vpop.permute.xlu0 %1208 }
0x17f9   :  { %1230 = vst.msk [vmem:[#allocation3 + $0x12] sm:$0x1] %vm650_vm13, %v1209_v60  ;;  %v2629_v60 = vld [vmem:[%s4230_s5 + $0x8] sm:$0xff] }
0x17fa   :  { %v3034_v14 = vpack.c.bf16 %v2629_v60, %v2628_v51 }
0x17fc   :  { %v1763_v5 = vpop.permute.xlu0 %1762  ;;  %3035 = vmatprep.subr.bf16.mxu0 %v3034_v14  ;;  %3042 = vmatprep.subr.bf16.mxu1 %v3034_v14 }
0x17fd   :  { %v3235_v55 = vpop.eup %3234  ;;  %1784 = vst.msk [vmem:[#allocation3 + $0x14] sm:$0x1] %vm650_vm13, %v1763_v5  ;;  %v2630_v5 = vld [vmem:[%s4230_s5 + $0x10] sm:$0xff]  ;;  %3037 = vmatpush3.bf16.msra.mxu0 %v3034_v14  ;;  %3044 = vmatpush3.bf16.msra.mxu1 %v3034_v14 }
0x17fe   :  { %2502 = vrot.lane.b32.xlu1 %v3235_v55, %s3238_s0 }
0x1800   :  { %v2317_v62 = vpop.permute.xlu0 %2316 }
0x1801   :  { %2338 = vst.msk [vmem:[#allocation3 + $0x16] sm:$0x1] %vm650_vm13, %v2317_v62 }
0x1802   :  { %638 = vrot.lane.b32.xlu1 %v621_v20, %s3240_s3 }
0x1804   :  { %v633_v15 = vpop.permute.xlu0 %632 }
0x1805   :  { %654 = vst.msk [vmem:[#allocation3 + $0x18] sm:$0x1] %vm650_vm13, %v633_v15 }
0x1806   :  { %939 = vrot.lane.b32.xlu1 %v922_v1, %s3240_s3 }
0x1808   :  { %v1211_v13 = vpop.permute.xlu0 %1210 }
0x1809   :  { %1231 = vst.msk [vmem:[#allocation3 + $0x1a] sm:$0x1] %vm650_vm13, %v1211_v13 }
0x180a   :  { %1216 = vrot.lane.b32.xlu1 %v1199_v30, %s3240_s3 }
0x180c   :  { %v1765_v31 = vpop.permute.xlu0 %1764 }
0x180d   :  { %1785 = vst.msk [vmem:[#allocation3 + $0x1c] sm:$0x1] %vm650_vm13, %v1765_v31 }
0x180e   :  { %1493 = vrot.lane.b32.xlu1 %v1476_v32, %s3240_s3 }
0x1810   :  { %v2319_v35 = vpop.permute.xlu0 %2318 }
0x1811   :  { %2339 = vst.msk [vmem:[#allocation3 + $0x1e] sm:$0x1] %vm650_vm13, %v2319_v35 }
0x1812   :  { %1770 = vrot.lane.b32.xlu1 %v1753_v17, %s3240_s3 }
0x1814   :  { %v635_v33 = vpop.permute.xlu0 %634 }
0x1815   :  { %655 = vst.msk [vmem:[#allocation3 + $0x20] sm:$0x1] %vm650_vm13, %v635_v33 }
0x1816   :  { %2047 = vrot.lane.b32.xlu1 %v2030_v24, %s3240_s3 }
0x1818   :  { %v1213_v42 = vpop.permute.xlu0 %1212 }
0x1819   :  { %1232 = vst.msk [vmem:[#allocation3 + $0x22] sm:$0x1] %vm650_vm13, %v1213_v42 }
0x181a   :  { %2324 = vrot.lane.b32.xlu1 %v2307_v41, %s3240_s3 }
0x181c   :  { %v1767_v16 = vpop.permute.xlu0 %1766 }
0x181d   :  { %1786 = vst.msk [vmem:[#allocation3 + $0x24] sm:$0x1] %vm650_vm13, %v1767_v16 }
0x181e   :  { %640 = vrot.lane.b32.xlu1 %v625_v46, %s3240_s3 }
0x1820   :  { %v2321_v48 = vpop.permute.xlu0 %2320 }
0x1821   :  { %2340 = vst.msk [vmem:[#allocation3 + $0x26] sm:$0x1] %vm650_vm13, %v2321_v48 }
0x1822   :  { %941 = vrot.lane.b32.xlu1 %v926_v49, %s3240_s3 }
0x1824   :  { %v637_v52 = vpop.permute.xlu0 %636 }
0x1825   :  { %656 = vst.msk [vmem:[#allocation3 + $0x28] sm:$0x1] %vm650_vm13, %v637_v52 }
0x1826   :  { %1218 = vrot.lane.b32.xlu1 %v1203_v54, %s3240_s3 }
0x1828   :  { %v1215_v58 = vpop.permute.xlu0 %1214 }
0x1829   :  { %1233 = vst.msk [vmem:[#allocation3 + $0x2a] sm:$0x1] %vm650_vm13, %v1215_v58 }
0x182a   :  { %1495 = vrot.lane.b32.xlu1 %v1480_v6, %s3240_s3 }
0x182c   :  { %v1769_v43 = vpop.permute.xlu0 %1768 }
0x182d   :  { %1787 = vst.msk [vmem:[#allocation3 + $0x2c] sm:$0x1] %vm650_vm13, %v1769_v43 }
0x182e   :  { %1772 = vrot.lane.b32.xlu1 %v1757_v19, %s3240_s3 }
0x1830   :  { %v2323_v21 = vpop.permute.xlu0 %2322 }
0x1831   :  { %2341 = vst.msk [vmem:[#allocation3 + $0x2e] sm:$0x1] %vm650_vm13, %v2323_v21 }
0x1832   :  { %2049 = vrot.lane.b32.xlu1 %v2034_v18, %s3240_s3 }
0x1834   :  { %v627_v0 = vpop.permute.xlu0 %626 }
0x1835   :  { %651 = vst.msk [vmem:[#allocation3] sm:$0x1] %vm650_vm13, %v627_v0 }
0x1836   :  { %2326 = vrot.lane.b32.xlu1 %v2311_v23, %s3240_s3 }
0x1838   :  { %v928_v63 = vpop.permute.xlu0 %927 }
0x1839   :  { %951 = vst.msk [vmem:[#allocation3 + $0x1] sm:$0x1] %vm650_vm13, %v928_v63 }
0x183c   :  { %v1205_v2 = vpop.permute.xlu0 %1204 }
0x183d   :  { %1228 = vst.msk [vmem:[#allocation3 + $0x2] sm:$0x1] %vm650_vm13, %v1205_v2 }
0x1840   :  { %v1482_v38 = vpop.permute.xlu0 %1481 }
0x1841   :  { %1505 = vst.msk [vmem:[#allocation3 + $0x3] sm:$0x1] %vm650_vm13, %v1482_v38 }
0x1844   :  { %v1759_v11 = vpop.permute.xlu0 %1758 }
0x1845   :  { %1782 = vst.msk [vmem:[#allocation3 + $0x4] sm:$0x1] %vm650_vm13, %v1759_v11 }
0x1848   :  { %v2036_v37 = vpop.permute.xlu0 %2035 }
0x1849   :  { %2059 = vst.msk [vmem:[#allocation3 + $0x5] sm:$0x1] %vm650_vm13, %v2036_v37 }
0x184c   :  { %v2313_v56 = vpop.permute.xlu0 %2312 }
0x184d   :  { %2336 = vst.msk [vmem:[#allocation3 + $0x6] sm:$0x1] %vm650_vm13, %v2313_v56 }
0x1850   :  { %v629_v26 = vpop.permute.xlu0 %628 }
0x1851   :  { %652 = vst.msk [vmem:[#allocation3 + $0x8] sm:$0x1] %vm650_vm13, %v629_v26 }
0x1854   :  { %v930_v40 = vpop.permute.xlu0 %929 }
0x1855   :  { %952 = vst.msk [vmem:[#allocation3 + $0x9] sm:$0x1] %vm650_vm13, %v930_v40 }
0x1858   :  { %v1207_v44 = vpop.permute.xlu0 %1206 }
0x1859   :  { %1229 = vst.msk [vmem:[#allocation3 + $0xa] sm:$0x1] %vm650_vm13, %v1207_v44  ;;  %v2823_v44 = vld [vmem:[%s4231_s6] ss:$0 sm:$0xff] }
0x185c   :  { %v1484_v53 = vpop.permute.xlu0 %1483 }
0x185d   :  { %1506 = vst.msk [vmem:[#allocation3 + $0xb] sm:$0x1] %vm650_vm13, %v1484_v53 }
0x1860   :  { %v1761_v47 = vpop.permute.xlu0 %1760 }
0x1861   :  { %1783 = vst.msk [vmem:[#allocation3 + $0xc] sm:$0x1] %vm650_vm13, %v1761_v47 }
0x1864   :  { %v2038_v8 = vpop.permute.xlu0 %2037 }
0x1865   :  { %2060 = vst.msk [vmem:[#allocation3 + $0xd] sm:$0x1] %vm650_vm13, %v2038_v8 }
0x1868   :  { %v2315_v9 = vpop.permute.xlu0 %2314 }
0x1869   :  { %2337 = vst.msk [vmem:[#allocation3 + $0xe] sm:$0x1] %vm650_vm13, %v2315_v9 }
0x1870   :  { %v2503_v29 = vpop.permute.xlu1 %2502 }
0x1871   :  { %v2505_v10 = vmul.f32 %v3861_v28, %v2503_v29  ;;  %v2631_v28 = vld [vmem:[%s4230_s5 + $0x18] sm:$0xff] }
0x1872   :  { %v3038_v20 = vpack.c.bf16 %v2631_v28, %v2630_v5 }
0x1873   :  { %v2507_v7 = vcombine.high %v2505_v10, %v2505_v10  ;;  %v2514_v55 = vrot.slane %v2505_v10, %v3756_v36 }
0x1874   :  { %v639_v62 = vpop.permute.xlu1 %638  ;;  %3039 = vmatprep.subr.bf16.mxu0 %v3038_v20  ;;  %3043 = vmatprep.subr.bf16.mxu1 %v3038_v20 }
0x1875   :  { %v2521_v15 = vrot.slane %v2507_v7, %v3756_v36  ;;  %v2522_v1 = vcombine.high %v2514_v55, %v2514_v55  ;;  %v2530_v22 = vrot.slane %v2514_v55, %v3756_v36  ;;  %657 = vst.msk [vmem:[#allocation3 + $0x30] sm:$0x1] %vm650_vm13, %v639_v62  ;;  %3041 = vmatpush3.bf16.msra.mxu0 %v3038_v20 }
0x1876   :  { %3045 = vmatpush3.bf16.msra.mxu1 %v3038_v20 }
0x1877   :  { %v2552_v12 = vcombine.high %v2530_v22, %v2530_v22  ;;  %v2544_v13 = vrot.slane %v2522_v1, %v3756_v36  ;;  %v2559_v30 = vrot.slane %v2530_v22, %v3773_v34  ;;  %v2537_v32 = vrot.slane %v2521_v15, %v3756_v36 }
0x1878   :  { %v940_v31 = vpop.permute.xlu1 %939  ;;  %v2523_v25 = vcombine.high %v2521_v15, %v2521_v15 }
0x1879   :  { %957 = vst.msk [vmem:[#allocation3 + $0x31] sm:$0x1] %vm650_vm13, %v940_v31  ;;  %v2567_v27 = vrot.slane %v2552_v12, %v3773_v34  ;;  %2588 = vrot.lane.b32.xlu0 %v2559_v30, %s3240_s3  ;;  %v2563_v17 = vrot.slane %v2544_v13, %v3773_v34  ;;  %v2554_v33 = vcombine.high %v2544_v13, %v2544_v13 }
0x187a   :  { %v2575_v24 = vrot.slane %v2537_v32, %v3773_v34  ;;  %v2551_v42 = vrot.slane %v2523_v25, %v3756_v36  ;;  %v2553_v16 = vcombine.high %v2537_v32, %v2537_v32 }
0x187b   :  { %2592 = vrot.lane.b32.xlu1 %v2567_v27, %s3240_s3  ;;  %v2571_v41 = vrot.slane %v2554_v33, %v3773_v34 }
0x187c   :  { %v1217_v35 = vpop.permute.xlu1 %1216  ;;  %v2579_v46 = vrot.slane %v2551_v42, %v3773_v34  ;;  %v2583_v48 = vrot.slane %v2553_v16, %v3773_v34  ;;  %v2555_v36 = vcombine.high %v2551_v42, %v2551_v42 }
0x187d   :  { %1234 = vst.msk [vmem:[#allocation3 + $0x32] sm:$0x1] %vm650_vm13, %v1217_v35  ;;  %2590 = vrot.lane.b32.xlu0 %v2563_v17, %s3240_s3 }
0x187e   :  { %v2587_v50 = vrot.slane %v2555_v36, %v3773_v34 }
0x187f   :  { %2596 = vrot.lane.b32.xlu1 %v2575_v24, %s3240_s3 }
0x1880   :  { %v1494_v39 = vpop.permute.xlu1 %1493 }
0x1881   :  { %1511 = vst.msk [vmem:[#allocation3 + $0x33] sm:$0x1] %vm650_vm13, %v1494_v39 }
0x1883   :  { %2594 = vrot.lane.b32.xlu1 %v2571_v41, %s3240_s3 }
0x1884   :  { %v1771_v61 = vpop.permute.xlu1 %1770 }
0x1885   :  { %1788 = vst.msk [vmem:[#allocation3 + $0x34] sm:$0x1] %vm650_vm13, %v1771_v61 }
0x1887   :  { %2598 = vrot.lane.b32.xlu1 %v2579_v46, %s3240_s3 }
0x1888   :  { %v2048_v45 = vpop.permute.xlu1 %2047 }
0x1889   :  { %2065 = vst.msk [vmem:[#allocation3 + $0x35] sm:$0x1] %vm650_vm13, %v2048_v45 }
0x188b   :  { %2600 = vrot.lane.b32.xlu1 %v2583_v48, %s3240_s3 }
0x188c   :  { %v2325_v49 = vpop.permute.xlu1 %2324 }
0x188d   :  { %2342 = vst.msk [vmem:[#allocation3 + $0x36] sm:$0x1] %vm650_vm13, %v2325_v49 }
0x188f   :  { %2602 = vrot.lane.b32.xlu1 %v2587_v50, %s3240_s3 }
0x1890   :  { %v641_v52 = vpop.permute.xlu1 %640 }
0x1891   :  { %658 = vst.msk [vmem:[#allocation3 + $0x38] sm:$0x1] %vm650_vm13, %v641_v52 }
0x1894   :  { %v942_v54 = vpop.permute.xlu1 %941 }
0x1895   :  { %958 = vst.msk [vmem:[#allocation3 + $0x39] sm:$0x1] %vm650_vm13, %v942_v54 }
0x1898   :  { %v1219_v3 = vpop.permute.xlu1 %1218 }
0x1899   :  { %1235 = vst.msk [vmem:[#allocation3 + $0x3a] sm:$0x1] %vm650_vm13, %v1219_v3 }
0x189c   :  { %v1496_v58 = vpop.permute.xlu1 %1495 }
0x189d   :  { %1512 = vst.msk [vmem:[#allocation3 + $0x3b] sm:$0x1] %vm650_vm13, %v1496_v58 }
0x18a0   :  { %v1773_v6 = vpop.permute.xlu1 %1772 }
0x18a1   :  { %1789 = vst.msk [vmem:[#allocation3 + $0x3c] sm:$0x1] %vm650_vm13, %v1773_v6 }
0x18a4   :  { %v2050_v57 = vpop.permute.xlu1 %2049 }
0x18a5   :  { %2066 = vst.msk [vmem:[#allocation3 + $0x3d] sm:$0x1] %vm650_vm13, %v2050_v57 }
0x18a8   :  { %v2327_v34 = vpop.permute.xlu1 %2326 }
0x18a9   :  { %2343 = vst.msk [vmem:[#allocation3 + $0x3e] sm:$0x1] %vm650_vm13, %v2327_v34 }
0x18eb   :  { %v2589_v43 = vpop.permute.xlu0 %2588 }
0x18ec   :  { %2612 = vst.msk [vmem:[#allocation3 + $0x7] sm:$0x1] %vm650_vm13, %v2589_v43 }
0x18ed   :  { %v2593_v19 = vpop.permute.xlu1 %2592 }
0x18ee   :  { %2614 = vst.msk [vmem:[#allocation3 + $0x17] sm:$0x1] %vm650_vm13, %v2593_v19 }
0x18ef   :  { %v2591_v4 = vpop.permute.xlu0 %2590 }
0x18f0   :  { %2613 = vst.msk [vmem:[#allocation3 + $0xf] sm:$0x1] %vm650_vm13, %v2591_v4 }
0x18f1   :  { %v2597_v21 = vpop.permute.xlu1 %2596 }
0x18f2   :  { %2616 = vst.msk [vmem:[#allocation3 + $0x27] sm:$0x1] %vm650_vm13, %v2597_v21 }
0x18f3   :  { %v2620_v18 = vld [vmem:[#allocation3] sm:$0xff] }
0x18f4   :  { %2884 = vmatprep.mubr.msk.f32.mxu0 %vm436_vm11, %v2620_v18 }
0x18f5   :  { %v2595_v59 = vpop.permute.xlu1 %2594  ;;  %v2622_v0 = vld [vmem:[#allocation3 + $0x10] sm:$0xff] }
0x18f6   :  { %2615 = vst.msk [vmem:[#allocation3 + $0x1f] sm:$0x1] %vm650_vm13, %v2595_v59  ;;  %2887 = vmatprep.mubr.msk.f32.mxu1 %vm436_vm11, %v2622_v0 }
0x18f7   :  { %v2621_v23 = vld [vmem:[#allocation3 + $0x8] sm:$0xff] }
0x18f8   :  { %2885 = vmatmul.mubr.msk.f32.vlgmr.msra.gmra.mrb[16].mxu0 %vm436_vm11, %v2621_v23 }
0x18f9   :  { %v2599_v63 = vpop.permute.xlu1 %2598  ;;  %v2624_v11 = vld [vmem:[#allocation3 + $0x20] sm:$0xff] }
0x18fa   :  { %2617 = vst.msk [vmem:[#allocation3 + $0x2f] sm:$0x1] %vm650_vm13, %v2599_v63 }
0x18fd   :  { %v2601_v2 = vpop.permute.xlu1 %2600  ;;  %v2623_v38 = vld [vmem:[#allocation3 + $0x18] sm:$0xff] }
0x18fe   :  { %2618 = vst.msk [vmem:[#allocation3 + $0x37] sm:$0x1] %vm650_vm13, %v2601_v2  ;;  %2888 = vmatmul.mubr.msk.f32.vlgmr.msra.gmra.mrb[8].mxu1 %vm436_vm11, %v2623_v38 }
0x18ff   :  { %2890 = vmatprep.mubr.msk.f32.mxu1 %vm436_vm11, %v2624_v11 }
0x1901   :  { %v2603_v37 = vpop.permute.xlu1 %2602  ;;  %v2625_v56 = vld [vmem:[#allocation3 + $0x28] sm:$0xff] }
0x1902   :  { %2619 = vst.msk [vmem:[#allocation3 + $0x3f] sm:$0x1] %vm650_vm13, %v2603_v37  ;;  %2891 = vmatmul.mubr.msk.f32.gmra.mrb[10].mxu1 %vm436_vm11, %v2625_v56 }
0x1905   :  { %v2626_v26 = vld [vmem:[#allocation3 + $0x30] sm:$0xff] }
0x1906   :  { %2893 = vmatprep.mubr.msk.f32.mxu1 %vm436_vm11, %v2626_v26 }
0x1909   :  { %v2627_v40 = vld [vmem:[#allocation3 + $0x38] sm:$0xff] }
0x190a   :  { %2894 = vmatmul.mubr.msk.f32.gmra.mrb[12].mxu1 %vm436_vm11, %v2627_v40 }
0x19cb   :  { %v2886_v53 = vpop.f32.mrb[16].mxu0 }
0x19cc   :  { %v2735_v47 = vadd.f32 %v2886_v53, %v2823_v44  ;;  %v2729_v8 = vpop.f32.mrb[17].mxu0 }
0x19cd   :  { %v2730_v9 = vadd.f32 %v2823_v44, %v2729_v8 }
0x19ce   :  { %2770 = vst.msk [vmem:[%s4232_s7 + $0x8] sm:$0xff] %vm2768_vm14, %v2735_v47 }
0x19cf   :  { %2769 = vst.msk [vmem:[%s4232_s7] sm:$0xff] %vm2768_vm14, %v2730_v9 }
0x19d1   :  { %v2889_v29 = vpop.f32.mrb[8].mxu1 }
0x19d2   :  { %v2745_v10 = vadd.f32 %v2889_v29, %v2823_v44  ;;  %v2739_v51 = vpop.f32.mrb[9].mxu1 }
0x19d3   :  { %v2740_v60 = vadd.f32 %v2823_v44, %v2739_v51 }
0x19d4   :  { %2772 = vst.msk [vmem:[%s4232_s7 + $0x18] sm:$0xff] %vm2768_vm14, %v2745_v10 }
0x19d5   :  { %2771 = vst.msk [vmem:[%s4232_s7 + $0x10] sm:$0xff] %vm2768_vm14, %v2740_v60  ;;  %v2892_v5 = vpop.f32.mrb[10].mxu1 }
0x19d6   :  { %v2755_v7 = vadd.f32 %v2892_v5, %v2823_v44  ;;  %v2749_v55 = vpop.f32.mrb[11].mxu1 }
0x19d7   :  { %v2750_v14 = vadd.f32 %v2823_v44, %v2749_v55 }
0x19d8   :  { %2774 = vst.msk [vmem:[%s4232_s7 + $0x28] sm:$0xff] %vm2768_vm14, %v2755_v7 }
0x19d9   :  { %2773 = vst.msk [vmem:[%s4232_s7 + $0x20] sm:$0xff] %vm2768_vm14, %v2750_v14 }
0x19dd   :  { %v2895_v28 = vpop.f32.mrb[12].mxu1 }
0x19de   :  { %v2765_v62 = vadd.f32 %v2895_v28, %v2823_v44  ;;  %v2759_v20 = vpop.f32.mrb[13].mxu1 }
0x19df   :  { %v2760_v15 = vadd.f32 %v2823_v44, %v2759_v20 }
0x19e0   :  { %2776 = vst.msk [vmem:[%s4232_s7 + $0x38] sm:$0xff] %vm2768_vm14, %v2765_v62 }
0x19e1   :  { %2775 = vst.msk [vmem:[%s4232_s7 + $0x30] sm:$0xff] %vm2768_vm14, %v2760_v15 }

</bundles_post_ra>
